<compile_context>
chip_gen: v7x
topology: tpu7x:2x2x1
jax: 0.10.0
libtpu: 0.0.40
codegen_flags: <defaults>
</compile_context>

<pallas_src>
import jax
import jax.numpy as jnp
from jax.experimental import pallas as pl
from jax.experimental.pallas import tpu as pltpu

# in_features for the Kaggle house-price data after pd.get_dummies(..., dummy_na=True)
# is data-dependent (~331); fixed deterministically here.
IN_FEATURES = 331
H1 = 256
H2 = 128
OUT = 1


def _round_up(a, b):
    return (a + b - 1) // b * b


def _cdiv(a, b):
    return -(-a // b)


def mlp_kernel(x_ref, w1_ref, b1_ref, w2_ref, b2_ref, w3_ref, b3_ref, o_ref):
    """Fused 3-layer MLP: relu(x @ W1 + b1) -> relu(. @ W2 + b2) -> . @ W3 + b3.

    Matmul inputs may be bf16; accumulation is always f32 (preferred_element_type)
    and biases are added in f32.
    """
    x = x_ref[...]
    h = jnp.dot(x, w1_ref[...], preferred_element_type=jnp.float32) + b1_ref[...]
    h = jnp.maximum(h, 0.0)
    h = h.astype(w2_ref.dtype)  # back to matmul dtype for the next MXU pass
    h = jnp.dot(h, w2_ref[...], preferred_element_type=jnp.float32) + b2_ref[...]
    h = jnp.maximum(h, 0.0)
    h = h.astype(w3_ref.dtype)
    y = jnp.dot(h, w3_ref[...], preferred_element_type=jnp.float32) + b3_ref[...]
    o_ref[...] = y.astype(o_ref.dtype)


def prepare_inputs(x, *, matmul_dtype=jnp.bfloat16):
    """One-time feature-pad (K -> multiple of 128) + cast of the dataset.

    Call this once per dataset / k-fold split so the per-forward hot path does
    not re-read and rewrite x in HBM for padding/casting.
    """
    d = x.shape[1]
    d_pad = _round_up(d, 128)
    if d_pad != d:
        x = jnp.pad(x, ((0, 0), (0, d_pad - d)))
    if x.dtype != matmul_dtype:
        x = x.astype(matmul_dtype)
    return x


def _clamp_tile_m_to_vmem(tile_m, d_pad, h1, h2, out_pad, matmul_dtype, out_dtype, budget):
    """Shrink tile_m (in 256-row steps) until the estimated live VMEM fits the budget."""
    in_b = jnp.dtype(matmul_dtype).itemsize
    out_b = jnp.dtype(out_dtype).itemsize
    w_bytes = 2 * in_b * (d_pad * h1 + h1 * h2 + h2 * out_pad) + 2 * 4 * (h1 + h2 + out_pad)

    def footprint(tm):
        x_stream = 2 * tm * d_pad * in_b       # double-buffered streamed input tile
        o_stream = 2 * tm * out_pad * out_b    # double-buffered streamed output tile
        acts = tm * (h1 + h2 + out_pad) * 4    # f32 intermediates live in VMEM/vregs
        return x_stream + o_stream + acts + w_bytes

    while tile_m > 256 and footprint(tile_m) > budget:
        tile_m -= 256
    return tile_m


def mlp_forward(x, w1, b1, w2, b2, w3, b3, *, tile_m=None,
                matmul_dtype=jnp.bfloat16, out_dtype=jnp.float32,
                vmem_budget_bytes=14 * 1024 * 1024):
    """x: (N, in_features) or pre-prepared (N, d_pad) in matmul_dtype.

    Weights pre-transposed to (in, out); biases (1, out).  Handles all padding
    internally (batch, K, OUT) and returns (N, OUT) in out_dtype-compatible f32.
    """
    n = x.shape[0]
    h1 = w1.shape[1]
    h2 = w2.shape[1]
    out_dim = w3.shape[1]

    # --- pad feature dim (K) to a multiple of 128 (331 -> 384 exactly; do NOT
    #     round further -- x is the dominant HBM stream).  Skipped when the
    #     caller already ran prepare_inputs().
    d_pad = _round_up(max(x.shape[1], w1.shape[0]), 128)
    if x.shape[1] != d_pad:
        x = jnp.pad(x, ((0, 0), (0, d_pad - x.shape[1])))
    if x.dtype != matmul_dtype:
        x = x.astype(matmul_dtype)
    if w1.shape[0] != d_pad:
        w1 = jnp.pad(w1, ((0, d_pad - w1.shape[0]), (0, 0)))

    # --- pad OUT (1 -> 128): lane-dense, unmasked output stores and a real MXU
    #     N dimension for the last matmul.  Extra columns are exact zeros.
    out_pad = _round_up(out_dim, 128)
    if out_pad != out_dim:
        w3 = jnp.pad(w3, ((0, 0), (0, out_pad - out_dim)))
        b3 = jnp.pad(b3, ((0, 0), (0, out_pad - out_dim)))

    # --- matmul-dtype weights; biases stay f32 (added to the f32 accumulator).
    w1 = w1.astype(matmul_dtype)
    w2 = w2.astype(matmul_dtype)
    w3 = w3.astype(matmul_dtype)
    b1 = b1.astype(jnp.float32)
    b2 = b2.astype(jnp.float32)
    b3 = b3.astype(jnp.float32)

    # --- batch tiling: large tiles to amortize the ~0.35us/step pipeline
    #     overhead; clamp by VMEM budget so it also compiles on v5e defaults.
    if tile_m is None:
        tile_m = 1024 if jnp.dtype(matmul_dtype) == jnp.dtype(jnp.float32) else 2048
    tile_m = max(256, _round_up(int(tile_m), 256))
    tile_m = min(tile_m, _round_up(n, 256))
    tile_m = _clamp_tile_m_to_vmem(tile_m, d_pad, h1, h2, out_pad,
                                   matmul_dtype, out_dtype, vmem_budget_bytes)

    # --- even grid length whenever the batch is split, so v7x's 2 TensorCores
    #     both get work on the "parallel" axis (harmless on 1-TC chips).
    num_tiles = _cdiv(n, tile_m)
    if num_tiles % 2 == 1 and n > 256:
        num_tiles += 1
        tile_m = min(tile_m, max(256, _round_up(_cdiv(n, num_tiles), 256)))
        num_tiles = _cdiv(n, tile_m)
        if num_tiles % 2 == 1:
            num_tiles += 1
    n_pad = num_tiles * tile_m
    if n_pad != n:
        x = jnp.pad(x, ((0, n_pad - n), (0, 0)))

    grid = (num_tiles,)
    # Weights/biases use a constant block index -> fetched once, resident in VMEM.
    full = lambda shape: pl.BlockSpec(shape, lambda i: (0, 0))

    y = pl.pallas_call(
        mlp_kernel,
        out_shape=jax.ShapeDtypeStruct((n_pad, out_pad), out_dtype),
        grid_spec=pltpu.PrefetchScalarGridSpec(
            num_scalar_prefetch=0,
            grid=grid,
            in_specs=[
                pl.BlockSpec((tile_m, d_pad), lambda i: (i, 0)),  # x tile (streamed)
                full((d_pad, h1)),                                # W1 (padded K)
                full((1, h1)),                                    # b1 (f32)
                full((h1, h2)),                                   # W2
                full((1, h2)),                                    # b2 (f32)
                full((h2, out_pad)),                              # W3 (padded OUT)
                full((1, out_pad)),                               # b3 (f32, padded OUT)
            ],
            out_specs=pl.BlockSpec((tile_m, out_pad), lambda i: (i, 0)),
        ),
        compiler_params=pltpu.CompilerParams(
            # Batch-tile axis is independent -> shard across TensorCores on
            # megacore parts (v7x); a sequential loop elsewhere.
            dimension_semantics=("parallel",),
            # Headroom over the ~<=14 MiB estimated live buffers (v5e's default
            # scoped limit is 16 MiB; physical VMEM is far larger on all parts).
            vmem_limit_bytes=32 * 1024 * 1024,
        ),
    )(x, w1, b1, w2, b2, w3, b3)

    # Drop batch padding and the 127 zero output columns.
    return y[:n, :out_dim].astype(jnp.float32)


def init_params(key):
    """Deterministic init mimicking torch.nn.Linear default (U[-1/sqrt(fan_in), +])."""
    ks = jax.random.split(key, 6)

    def linear(kw, kb, fan_in, fan_out):
        bound = 1.0 / jnp.sqrt(jnp.float32(fan_in))
        # torch stores (out, in); we keep (in, out) for x @ W.
        w = jax.random.uniform(kw, (fan_in, fan_out), jnp.float32, -bound, bound)
        b = jax.random.uniform(kb, (1, fan_out), jnp.float32, -bound, bound)
        return w, b

    w1, b1 = linear(ks[0], ks[1], IN_FEATURES, H1)
    w2, b2 = linear(ks[2], ks[3], H1, H2)
    w3, b3 = linear(ks[4], ks[5], H2, OUT)
    return w1, b1, w2, b2, w3, b3


def mlp_reference(x, w1, b1, w2, b2, w3, b3):
    hp = jax.lax.Precision.HIGHEST
    h = jnp.maximum(jnp.dot(x, w1, precision=hp) + b1, 0.0)
    h = jnp.maximum(jnp.dot(h, w2, precision=hp) + b2, 0.0)
    return jnp.dot(h, w3, precision=hp) + b3


if __name__ == "__main__":
    key = jax.random.PRNGKey(0)
    k_params, k_x = jax.random.split(key)

    batch = 8  # small, non-multiple-friendly batch; wrapper pads internally
    x = jax.random.normal(k_x, (batch, IN_FEATURES), dtype=jnp.float32)
    params = init_params(k_params)

    y_ref = mlp_reference(x, *params)

    # Default (bf16 MXU) path, with the pad/cast hoisted via prepare_inputs.
    x_prep = prepare_inputs(x, matmul_dtype=jnp.bfloat16)
    y_bf16 = jax.block_until_ready(mlp_forward(x_prep, *params))
    assert y_bf16.shape == (batch, OUT)
    assert jnp.allclose(y_bf16, y_ref, atol=5e-2, rtol=5e-2), "bf16 path mismatch vs reference"

    # f32 escape hatch (for unstandardized features), tighter tolerance.
    y_f32 = jax.block_until_ready(mlp_forward(x, *params, matmul_dtype=jnp.float32))
    assert y_f32.shape == (batch, OUT)
    assert jnp.allclose(y_f32, y_ref, atol=2e-3, rtol=2e-3), "f32 path mismatch vs reference"

    print("KERNEL_OK")
</pallas_src>

<mosaic_0001>
module attributes {stable_mosaic.version = 11 : i64} {
  func.func @mlp_kernel(%arg0: i32, %arg1: memref<256x384xbf16, #tpu.memory_space<vmem>>, %arg2: memref<384x256xbf16, #tpu.memory_space<vmem>>, %arg3: memref<1x256xf32, #tpu.memory_space<vmem>>, %arg4: memref<256x128xbf16, #tpu.memory_space<vmem>>, %arg5: memref<1x128xf32, #tpu.memory_space<vmem>>, %arg6: memref<128x128xbf16, #tpu.memory_space<vmem>>, %arg7: memref<1x128xf32, #tpu.memory_space<vmem>>, %arg8: memref<256x128xf32, #tpu.memory_space<vmem>>) attributes {dimension_semantics = [#tpu.dimension_semantics<parallel>], iteration_bounds = array<i64: 1>, scalar_prefetch = 0 : i64, scratch_operands = 0 : i64, tpu.core_type = #tpu.core_type<tc>, window_params = [{transform_indices = @transform_0, window_bounds = array<i64: 256, 384>}, {pipeline_mode = #tpu.pipeline_mode<synchronous>, transform_indices = @transform_1, window_bounds = array<i64: 384, 256>}, {pipeline_mode = #tpu.pipeline_mode<synchronous>, transform_indices = @transform_2, window_bounds = array<i64: 1, 256>}, {pipeline_mode = #tpu.pipeline_mode<synchronous>, transform_indices = @transform_3, window_bounds = array<i64: 256, 128>}, {pipeline_mode = #tpu.pipeline_mode<synchronous>, transform_indices = @transform_4, window_bounds = array<i64: 1, 128>}, {pipeline_mode = #tpu.pipeline_mode<synchronous>, transform_indices = @transform_5, window_bounds = array<i64: 128, 128>}, {pipeline_mode = #tpu.pipeline_mode<synchronous>, transform_indices = @transform_6, window_bounds = array<i64: 1, 128>}, {transform_indices = @transform_7, window_bounds = array<i64: 256, 128>}]} {
    %c0 = arith.constant 0 : index
    %c0_0 = arith.constant 0 : index
    %0 = vector.load %arg1[%c0, %c0_0] : memref<256x384xbf16, #tpu.memory_space<vmem>>, vector<256x384xbf16>
    %c0_1 = arith.constant 0 : index
    %c0_2 = arith.constant 0 : index
    %1 = vector.load %arg2[%c0_1, %c0_2] : memref<384x256xbf16, #tpu.memory_space<vmem>>, vector<384x256xbf16>
    %cst = arith.constant dense<0.000000e+00> : vector<256x256xf32>
    %2 = tpu.matmul %0, %1, %cst {dimension_numbers = #tpu.dot_dimension_numbers<[1], [0], [0], [1], [0, 0, 1, 1], [], []>} : vector<256x384xbf16>, vector<384x256xbf16>, vector<256x256xf32> -> vector<256x256xf32>
    %c0_3 = arith.constant 0 : index
    %c0_4 = arith.constant 0 : index
    %3 = vector.load %arg3[%c0_3, %c0_4] : memref<1x256xf32, #tpu.memory_space<vmem>>, vector<1x256xf32>
    %4 = vector.broadcast %3 : vector<1x256xf32> to vector<256x256xf32>
    %5 = arith.addf %2, %4 : vector<256x256xf32>
    %cst_5 = arith.constant 0.000000e+00 : f32
    %6 = vector.broadcast %cst_5 : f32 to vector<256x256xf32>
    %7 = arith.maximumf %5, %6 : vector<256x256xf32>
    %8 = arith.truncf %7 : vector<256x256xf32> to vector<256x256xbf16>
    %c0_6 = arith.constant 0 : index
    %c0_7 = arith.constant 0 : index
    %9 = vector.load %arg4[%c0_6, %c0_7] : memref<256x128xbf16, #tpu.memory_space<vmem>>, vector<256x128xbf16>
    %cst_8 = arith.constant dense<0.000000e+00> : vector<256x128xf32>
    %10 = tpu.matmul %8, %9, %cst_8 {dimension_numbers = #tpu.dot_dimension_numbers<[1], [0], [0], [1], [0, 0, 1, 1], [], []>} : vector<256x256xbf16>, vector<256x128xbf16>, vector<256x128xf32> -> vector<256x128xf32>
    %c0_9 = arith.constant 0 : index
    %c0_10 = arith.constant 0 : index
    %11 = vector.load %arg5[%c0_9, %c0_10] : memref<1x128xf32, #tpu.memory_space<vmem>>, vector<1x128xf32>
    %12 = vector.broadcast %11 : vector<1x128xf32> to vector<256x128xf32>
    %13 = arith.addf %10, %12 : vector<256x128xf32>
    %cst_11 = arith.constant 0.000000e+00 : f32
    %14 = vector.broadcast %cst_11 : f32 to vector<256x128xf32>
    %15 = arith.maximumf %13, %14 : vector<256x128xf32>
    %16 = arith.truncf %15 : vector<256x128xf32> to vector<256x128xbf16>
    %c0_12 = arith.constant 0 : index
    %c0_13 = arith.constant 0 : index
    %17 = vector.load %arg6[%c0_12, %c0_13] : memref<128x128xbf16, #tpu.memory_space<vmem>>, vector<128x128xbf16>
    %cst_14 = arith.constant dense<0.000000e+00> : vector<256x128xf32>
    %18 = tpu.matmul %16, %17, %cst_14 {dimension_numbers = #tpu.dot_dimension_numbers<[1], [0], [0], [1], [0, 0, 1, 1], [], []>} : vector<256x128xbf16>, vector<128x128xbf16>, vector<256x128xf32> -> vector<256x128xf32>
    %c0_15 = arith.constant 0 : index
    %c0_16 = arith.constant 0 : index
    %19 = vector.load %arg7[%c0_15, %c0_16] : memref<1x128xf32, #tpu.memory_space<vmem>>, vector<1x128xf32>
    %20 = vector.broadcast %19 : vector<1x128xf32> to vector<256x128xf32>
    %21 = arith.addf %18, %20 : vector<256x128xf32>
    %c0_17 = arith.constant 0 : index
    %c0_18 = arith.constant 0 : index
    %22 = vector.load %arg8[%c0_17, %c0_18] : memref<256x128xf32, #tpu.memory_space<vmem>>, vector<256x128xf32>
    tpu.vector_store %arg8[%c0_17, %c0_18], %21 {strides = array<i32>} : memref<256x128xf32, #tpu.memory_space<vmem>>, vector<256x128xf32>,
    return
  }
  func.func @transform_0(%arg0: i32) -> (i32, i32) {
    %c0_i32 = arith.constant 0 : i32
    %c0_i32_0 = arith.constant 0 : i32
    return %arg0, %c0_i32 : i32, i32
  }
  func.func @transform_1(%arg0: i32) -> (i32, i32) {
    %c0_i32 = arith.constant 0 : i32
    %c0_i32_0 = arith.constant 0 : i32
    %c0_i32_1 = arith.constant 0 : i32
    return %c0_i32, %c0_i32_0 : i32, i32
  }
  func.func @transform_2(%arg0: i32) -> (i32, i32) {
    %c0_i32 = arith.constant 0 : i32
    %c0_i32_0 = arith.constant 0 : i32
    %c0_i32_1 = arith.constant 0 : i32
    return %c0_i32, %c0_i32_0 : i32, i32
  }
  func.func @transform_3(%arg0: i32) -> (i32, i32) {
    %c0_i32 = arith.constant 0 : i32
    %c0_i32_0 = arith.constant 0 : i32
    %c0_i32_1 = arith.constant 0 : i32
    return %c0_i32, %c0_i32_0 : i32, i32
  }
  func.func @transform_4(%arg0: i32) -> (i32, i32) {
    %c0_i32 = arith.constant 0 : i32
    %c0_i32_0 = arith.constant 0 : i32
    %c0_i32_1 = arith.constant 0 : i32
    return %c0_i32, %c0_i32_0 : i32, i32
  }
  func.func @transform_5(%arg0: i32) -> (i32, i32) {
    %c0_i32 = arith.constant 0 : i32
    %c0_i32_0 = arith.constant 0 : i32
    %c0_i32_1 = arith.constant 0 : i32
    return %c0_i32, %c0_i32_0 : i32, i32
  }
  func.func @transform_6(%arg0: i32) -> (i32, i32) {
    %c0_i32 = arith.constant 0 : i32
    %c0_i32_0 = arith.constant 0 : i32
    %c0_i32_1 = arith.constant 0 : i32
    return %c0_i32, %c0_i32_0 : i32, i32
  }
  func.func @transform_7(%arg0: i32) -> (i32, i32) {
    %c0_i32 = arith.constant 0 : i32
    %c0_i32_0 = arith.constant 0 : i32
    return %arg0, %c0_i32 : i32, i32
  }
}

</mosaic_0001>

<bundles_post_ra>
// kernel: tpu_custom_call.1
= control target key start
LH: loop header
LB: loop body
LE: loop exit
PB: predicated region body
PF: predicated region fallthrough
CT: control target
= control target key end

     0   :  { %12 = vsyncpa [#allocation3], 0  ;;  %s2979_s0 = inlined_call_operand.hbm [shape: bf16[256,384], index: 0, kind: input, shape index: {}]   ;;  %s2980_s1 = inlined_call_operand.hbm [shape: bf16[384,256], index: 1, kind: input, shape index: {}]   ;;  %s2981_s2 = inlined_call_operand.vmem [shape: f32[1,256], index: 2, kind: input, shape index: {}]   ;;  %s2982_s3 = inlined_call_operand.hbm [shape: bf16[256,128], index: 3, kind: input, shape index: {}]   ;;  %s2983_s4 = inlined_call_operand.vmem [shape: f32[1,128], index: 4, kind: input, shape index: {}]   ;;  %s2984_s5 = inlined_call_operand.hbm [shape: bf16[128,128], index: 5, kind: input, shape index: {}]   ;;  %s2985_s6 = inlined_call_operand.vmem [shape: f32[1,128], index: 6, kind: input, shape index: {}]   ;;  %s2986_s7 = inlined_call_operand.hbm [shape: f32[256,128], index: 7, kind: output, shape index: {}]  }
   0x1   :  { %13 = vsyncpa [#allocation6], 0 }
   0x2   :  { %14 = vsyncpa [#allocation9], 0 }
   0x3   :  { %15 = vsyncpa [#allocation4], 0  ;;  %s2552_s24 = smov [#allocation5]   ;;  %s2434_s28 = scalar_lea.hbm %s2980_s1, 6144 }
   0x4   :  { %s33_s25 = sshll.u32 %s2552_s24, 4  ;;  %p2435_p0 = scmp.ne.s32.totalorder %s2980_s1, %s2434_s28  ;;  %s34_s25 = int_to_ptr.vmem [resolvable:$true] %s33_s25 }
   0x5   :  { %p2438_p1 = scmp.lt.u32.totalorder %s2434_s28, %s2980_s1 }
   0x7   :  { %p2440_p2 = pnand %p2438_p1, %p2435_p0 }
   0x9   :  { %2443 = shalt.err (!%p2440_p2)
}
   0xa   :  { %s2444_s10 = scalar_lea.vmem %s34_s25, 6144  ;;  %p2449_p4 = scmp.lt.s32.totalorder %s34_s25, %s34_s25 }
   0xb   :  { %p2445_p3 = scmp.ne.s32.totalorder %s34_s25, %s2444_s10  ;;  %p2450_p5 = scmp.lt.s32.totalorder %s2444_s10, %s2444_s10 }
   0xd   :  { %p2451_p6 = por %p2450_p5, %p2449_p4 }
   0xf   :  { %p2452_p7 = pnand %p2451_p6, %p2445_p3 }
  0x11   :  { %2455 = shalt.err (!%p2452_p7)
}
  0x12   :  { %s2553_s11 = smov 128   ;;  %s2554_s12 = smov 8  }
  0x13   :  { %39 = dma.hbm_to_vmem [thread:$0]  %s2980_s1, 6144, %s34_s25, [#allocation6], %s2553_s11, %s2553_s11, %s2554_s12  }
  0x14   :  { %s2555_s15 = smov [#allocation2]   ;;  %s2456_s19 = scalar_lea.hbm %s2979_s0, 6144 }
  0x15   :  { %s21_s16 = sshll.u32 %s2555_s15, 4  ;;  %p2457_p8 = scmp.ne.s32.totalorder %s2979_s0, %s2456_s19  ;;  %s22_s16 = int_to_ptr.vmem [resolvable:$true] %s21_s16 }
  0x16   :  { %p2460_p9 = scmp.lt.u32.totalorder %s2456_s19, %s2979_s0 }
  0x18   :  { %p2462_p10 = pnand %p2460_p9, %p2457_p8 }
  0x1a   :  { %2465 = shalt.err (!%p2462_p10)
}
  0x1b   :  { %s2466_s24 = scalar_lea.vmem %s22_s16, 6144  ;;  %p2471_p12 = scmp.lt.s32.totalorder %s22_s16, %s22_s16 }
  0x1c   :  { %p2467_p11 = scmp.ne.s32.totalorder %s22_s16, %s2466_s24  ;;  %p2472_p13 = scmp.lt.s32.totalorder %s2466_s24, %s2466_s24 }
  0x1e   :  { %p2473_p0 = por %p2472_p13, %p2471_p12 }
  0x20   :  { %p2474_p1 = pnand %p2473_p0, %p2467_p11 }
  0x22   :  { %2477 = shalt.err (!%p2474_p1)
}
  0x23   :  { %s2556_s1 = smov 192   ;;  %s2557_s25 = smov 12  }
  0x24   :  { %27 = dma.hbm_to_vmem [thread:$0]  %s2979_s0, 6144, %s22_s16, [#allocation3], %s2556_s1, %s2556_s1, %s2557_s25  }
  0x25   :  { %s2558_s28 = smov [#allocation7]   ;;  %s2478_s9 = scalar_lea.hbm %s2982_s3, 2048 }
  0x26   :  { %s47_s29 = sshll.u32 %s2558_s28, 4  ;;  %p2479_p2 = scmp.ne.s32.totalorder %s2982_s3, %s2478_s9  ;;  %s48_s29 = int_to_ptr.vmem [resolvable:$true] %s47_s29 }
  0x27   :  { %p2482_p3 = scmp.lt.u32.totalorder %s2478_s9, %s2982_s3 }
  0x29   :  { %p2484_p4 = pnand %p2482_p3, %p2479_p2 }
  0x2b   :  { %2487 = shalt.err (!%p2484_p4)
}
  0x2c   :  { %s2488_s17 = scalar_lea.vmem %s48_s29, 2048  ;;  %p2493_p6 = scmp.lt.s32.totalorder %s48_s29, %s48_s29 }
  0x2d   :  { %p2489_p5 = scmp.ne.s32.totalorder %s48_s29, %s2488_s17  ;;  %p2494_p7 = scmp.lt.s32.totalorder %s2488_s17, %s2488_s17 }
  0x2f   :  { %p2495_p8 = por %p2494_p7, %p2493_p6 }
  0x31   :  { %p2496_p9 = pnand %p2495_p8, %p2489_p5 }
  0x33   :  { %2499 = shalt.err (!%p2496_p9)
}
  0x34   :  { %s2559_s0 = smov 64   ;;  %s2560_s16 = smov 4  }
  0x35   :  { %53 = dma.hbm_to_vmem [thread:$0]  %s2982_s3, 2048, %s48_s29, [#allocation6], %s2559_s0, %s2559_s0, %s2560_s16  }
  0x36   :  { %s2561_s20 = smov [#allocation8]   ;;  %s2500_s24 = scalar_lea.hbm %s2984_s5, 1024 }
  0x37   :  { %s61_s21 = sshll.u32 %s2561_s20, 4  ;;  %p2501_p10 = scmp.ne.s32.totalorder %s2984_s5, %s2500_s24  ;;  %s62_s21 = int_to_ptr.vmem [resolvable:$true] %s61_s21 }
  0x38   :  { %p2504_p11 = scmp.lt.u32.totalorder %s2500_s24, %s2984_s5 }
  0x3a   :  { %p2506_p12 = pnand %p2504_p11, %p2501_p10 }
  0x3c   :  { %2509 = shalt.err (!%p2506_p12)
}
  0x3d   :  { %s2510_s28 = scalar_lea.vmem %s62_s21, 1024  ;;  %p2515_p0 = scmp.lt.s32.totalorder %s62_s21, %s62_s21 }
  0x3e   :  { %p2511_p13 = scmp.ne.s32.totalorder %s62_s21, %s2510_s28  ;;  %p2516_p1 = scmp.lt.s32.totalorder %s2510_s28, %s2510_s28 }
  0x40   :  { %p2517_p2 = por %p2516_p1, %p2515_p0 }
  0x42   :  { %p2518_p3 = pnand %p2517_p2, %p2511_p13 }
  0x44   :  { %2521 = shalt.err (!%p2518_p3)
}
  0x45   :  { %67 = dma.hbm_to_vmem [thread:$0]  %s2984_s5, 1024, %s62_s21, [#allocation9], %s2559_s0, %s2559_s0, %s2560_s16  }
  0x46   :  { %2544 = dma.done.wait [#allocation3], 6144  }
  0x47   :  { %2545 = vsyncadd [#allocation3], 4294961152 }
  0x48   :  { %2546 = dma.done.wait [#allocation6], 8192  }
  0x49   :  { %2547 = vsyncadd [#allocation6], 4294959104 }
  0x4a   :  { %2548 = dma.done.wait [#allocation9], 1024  }
  0x4b   :  { %2549 = vsyncadd [#allocation9], 4294966272  ;;  %v2274_v0 = vld [vmem:[#allocation5 + $0x4] ss:$8 sps:$4 sm:$0xff]   ;;  %v2276_v1 = vld [vmem:[#allocation5] ss:$8 sps:$4 sm:$0xff]  }
  0x4c   :  { %703 = vmatprep.subr.bf16.mxu0 %v2274_v0  ;;  %v2277_v2 = vld [vmem:[#allocation5 + $0x14] ss:$8 sps:$4 sm:$0xff]   ;;  %v2279_v3 = vld [vmem:[#allocation5 + $0x10] ss:$8 sps:$4 sm:$0xff]   ;;  %v2280_v4 = vld [vmem:[#allocation5 + $0x24] ss:$8 sps:$4 sm:$0xff]  }
  0x4d   :  { %704 = vmatpush1.bf16.msra.mxu0 %v2276_v1  ;;  %v2282_v5 = vld [vmem:[#allocation5 + $0x20] ss:$8 sps:$4 sm:$0xff]   ;;  %v2283_v6 = vld [vmem:[#allocation5 + $0x34] ss:$8 sps:$4 sm:$0xff]   ;;  %v2285_v7 = vld [vmem:[#allocation5 + $0x30] ss:$8 sps:$4 sm:$0xff]  }
  0x4e   :  { %705 = vmatprep.subr.bf16.mxu0 %v2277_v2  ;;  %v2286_v8 = vld [vmem:[#allocation5 + $0x44] ss:$8 sps:$4 sm:$0xff]   ;;  %v2288_v9 = vld [vmem:[#allocation5 + $0x40] ss:$8 sps:$4 sm:$0xff]   ;;  %v2289_v10 = vld [vmem:[#allocation5 + $0x54] ss:$8 sps:$4 sm:$0xff]  }
  0x4f   :  { %v2291_v11 = vld [vmem:[#allocation5 + $0x50] ss:$8 sps:$4 sm:$0xff]   ;;  %v2562_v12 = vmov 0   ;;  %v2292_v13 = vld [vmem:[#allocation5 + $0x64] ss:$8 sps:$4 sm:$0xff]  }
  0x50   :  { %1028 = vmatprep.mubr.bf16.mxu1 %v2562_v12  ;;  %v2294_v14 = vld [vmem:[#allocation5 + $0x60] ss:$8 sps:$4 sm:$0xff]   ;;  %v2324_v15 = vld [vmem:[#allocation2 + $0x4] ss:$12 sps:$4 sm:$0xff]   ;;  %v2295_v18 = vld [vmem:[#allocation5 + $0x74] ss:$8 sps:$4 sm:$0xff]  }
  0x51   :  { %706 = vmatpush1.bf16.msra.mxu0 %v2279_v3  ;;  %v2656_v16 = vld [vmem:[#allocation5 + $0x100] ss:$8 sps:$4 sm:$0xff]   ;;  %v2658_v17 = vld [vmem:[#allocation5 + $0x104] ss:$8 sps:$4 sm:$0xff]   ;;  %735 = vmatprep.mubr.bf16.mxu0 %v2324_v15  ;;  %v2297_v19 = vld [vmem:[#allocation5 + $0x70] ss:$8 sps:$4 sm:$0xff]  }
  0x52   :  { %707 = vmatprep.subr.bf16.mxu0 %v2280_v4  ;;  %2118 = vmatprep.subr.bf16.mxu1 %v2658_v17  ;;  %v2662_v20 = vld [vmem:[#allocation5 + $0x110] ss:$8 sps:$4 sm:$0xff]   ;;  %v2664_v21 = vld [vmem:[#allocation5 + $0x114] ss:$8 sps:$4 sm:$0xff]   ;;  %v2298_v22 = vld [vmem:[#allocation5 + $0x84] ss:$8 sps:$4 sm:$0xff]  }
  0x53   :  { %2126 = vmatpush1.bf16.msra.mxu1 %v2656_v16  ;;  %v2300_v23 = vld [vmem:[#allocation5 + $0x80] ss:$8 sps:$4 sm:$0xff]   ;;  %v2670_v25 = vld [vmem:[#allocation5 + $0x124] ss:$8 sps:$4 sm:$0xff]   ;;  %v2301_v26 = vld [vmem:[#allocation5 + $0x94] ss:$8 sps:$4 sm:$0xff]  }
  0x54   :  { %2119 = vmatprep.subr.bf16.mxu1 %v2664_v21  ;;  %v2668_v24 = vld [vmem:[#allocation5 + $0x120] ss:$8 sps:$4 sm:$0xff]   ;;  %v2303_v27 = vld [vmem:[#allocation5 + $0x90] ss:$8 sps:$4 sm:$0xff]   ;;  %v2676_v29 = vld [vmem:[#allocation5 + $0x134] ss:$8 sps:$4 sm:$0xff]  }
  0x55   :  { %708 = vmatpush1.bf16.msra.mxu0 %v2282_v5  ;;  %v2674_v28 = vld [vmem:[#allocation5 + $0x130] ss:$8 sps:$4 sm:$0xff]   ;;  %v2304_v30 = vld [vmem:[#allocation5 + $0xa4] ss:$8 sps:$4 sm:$0xff]   ;;  %v2306_v31 = vld [vmem:[#allocation5 + $0xa0] ss:$8 sps:$4 sm:$0xff]  }
  0x56   :  { %709 = vmatprep.subr.bf16.mxu0 %v2283_v6  ;;  %v2307_v32 = vld [vmem:[#allocation5 + $0xb4] ss:$8 sps:$4 sm:$0xff]   ;;  %v2680_v33 = vld [vmem:[#allocation5 + $0x140] ss:$8 sps:$4 sm:$0xff]   ;;  %v2682_v34 = vld [vmem:[#allocation5 + $0x144] ss:$8 sps:$4 sm:$0xff]  }
  0x57   :  { %2127 = vmatpush1.bf16.msra.mxu1 %v2662_v20  ;;  %v2684_v35 = vld [vmem:[#allocation5 + $0x154] ss:$8 sps:$4 sm:$0xff]   ;;  %v2688_v36 = vld [vmem:[#allocation5 + $0x150] ss:$8 sps:$4 sm:$0xff]   ;;  %v2691_v38 = vld [vmem:[#allocation5 + $0x164] ss:$8 sps:$4 sm:$0xff]  }
  0x58   :  { %2120 = vmatprep.subr.bf16.mxu1 %v2670_v25  ;;  %v2309_v37 = vld [vmem:[#allocation5 + $0xb0] ss:$8 sps:$4 sm:$0xff]   ;;  %v2310_v39 = vld [vmem:[#allocation5 + $0xc4] ss:$8 sps:$4 sm:$0xff]   ;;  %v2312_v40 = vld [vmem:[#allocation5 + $0xc0] ss:$8 sps:$4 sm:$0xff]  }
  0x59   :  { %710 = vmatpush1.bf16.msra.mxu0 %v2285_v7  ;;  %v2694_v41 = vld [vmem:[#allocation5 + $0x160] ss:$8 sps:$4 sm:$0xff]   ;;  %v2697_v42 = vld [vmem:[#allocation5 + $0x174] ss:$8 sps:$4 sm:$0xff]   ;;  %v2700_v44 = vld [vmem:[#allocation5 + $0x170] ss:$8 sps:$4 sm:$0xff]  }
  0x5a   :  { %711 = vmatprep.subr.bf16.mxu0 %v2286_v8  ;;  %v2313_v43 = vld [vmem:[#allocation5 + $0xd4] ss:$8 sps:$4 sm:$0xff]   ;;  %v2315_v45 = vld [vmem:[#allocation5 + $0xd0] ss:$8 sps:$4 sm:$0xff]   ;;  %v2316_v46 = vld [vmem:[#allocation5 + $0xe4] ss:$8 sps:$4 sm:$0xff]  }
  0x5b   :  { %2128 = vmatpush1.bf16.msra.mxu1 %v2668_v24  ;;  %v2379_v47 = vld [vmem:[#allocation2 + $0xf8] ss:$12 sps:$4 sm:$0xff]   ;;  %v2318_v48 = vld [vmem:[#allocation5 + $0xe0] ss:$8 sps:$4 sm:$0xff]   ;;  %v2319_v49 = vld [vmem:[#allocation5 + $0xf4] ss:$8 sps:$4 sm:$0xff]  }
  0x5c   :  { %2121 = vmatprep.subr.bf16.mxu1 %v2676_v29  ;;  %v2321_v50 = vld [vmem:[#allocation5 + $0xf0] ss:$8 sps:$4 sm:$0xff]   ;;  %v2322_v51 = vld [vmem:[#allocation2] ss:$12 sps:$4 sm:$0xff]   ;;  %v2328_v53 = vld [vmem:[#allocation2 + $0x1c] ss:$12 sps:$4 sm:$0xff]  }
  0x5d   :  { %712 = vmatpush1.bf16.msra.mxu0 %v2288_v9  ;;  %v2383_v52 = vld [vmem:[#allocation2 + $0x110] ss:$12 sps:$4 sm:$0xff]   ;;  %v2387_v54 = vld [vmem:[#allocation2 + $0x128] ss:$12 sps:$4 sm:$0xff]   ;;  %v2330_v55 = vld [vmem:[#allocation2 + $0x18] ss:$12 sps:$4 sm:$0xff]  }
  0x5e   :  { %713 = vmatprep.subr.bf16.mxu0 %v2289_v10  ;;  %v2331_v56 = vld [vmem:[#allocation2 + $0x34] ss:$12 sps:$4 sm:$0xff]   ;;  %v2333_v58 = vld [vmem:[#allocation2 + $0x30] ss:$12 sps:$4 sm:$0xff]   ;;  %v2337_v59 = vld [vmem:[#allocation2 + $0x4c] ss:$12 sps:$4 sm:$0xff]  }
  0x5f   :  { %2129 = vmatpush1.bf16.msra.mxu1 %v2674_v28  ;;  %v2391_v57 = vld [vmem:[#allocation2 + $0x140] ss:$12 sps:$4 sm:$0xff]   ;;  %v2395_v60 = vld [vmem:[#allocation2 + $0x158] ss:$12 sps:$4 sm:$0xff]   ;;  %v2339_v61 = vld [vmem:[#allocation2 + $0x48] ss:$12 sps:$4 sm:$0xff]  }
  0x60   :  { %2122 = vmatprep.subr.bf16.mxu1 %v2682_v34  ;;  %v2340_v62 = vld [vmem:[#allocation2 + $0x64] ss:$12 sps:$4 sm:$0xff]   ;;  %v2342_v0 = vld [vmem:[#allocation2 + $0x60] ss:$12 sps:$4 sm:$0xff]   ;;  %v2346_v1 = vld [vmem:[#allocation2 + $0x7c] ss:$12 sps:$4 sm:$0xff]  }
  0x61   :  { %714 = vmatpush1.bf16.msra.mxu0 %v2291_v11  ;;  %v2399_v63 = vld [vmem:[#allocation2 + $0x170] ss:$12 sps:$4 sm:$0xff]   ;;  %v2348_v2 = vld [vmem:[#allocation2 + $0x78] ss:$12 sps:$4 sm:$0xff]   ;;  %v2349_v3 = vld [vmem:[#allocation2 + $0x94] ss:$12 sps:$4 sm:$0xff]  }
  0x62   :  { %715 = vmatprep.subr.bf16.mxu0 %v2292_v13  ;;  %v2351_v4 = vld [vmem:[#allocation2 + $0x90] ss:$12 sps:$4 sm:$0xff]   ;;  %v2355_v5 = vld [vmem:[#allocation2 + $0xac] ss:$12 sps:$4 sm:$0xff]   ;;  %v2357_v6 = vld [vmem:[#allocation2 + $0xa8] ss:$12 sps:$4 sm:$0xff]  }
  0x63   :  { %2130 = vmatpush1.bf16.msra.mxu1 %v2680_v33  ;;  %v2358_v7 = vld [vmem:[#allocation2 + $0xc4] ss:$12 sps:$4 sm:$0xff]   ;;  %v2360_v8 = vld [vmem:[#allocation2 + $0xc0] ss:$12 sps:$4 sm:$0xff]   ;;  %v2366_v9 = vld [vmem:[#allocation2 + $0xdc] ss:$12 sps:$4 sm:$0xff]  }
  0x64   :  { %2123 = vmatprep.subr.bf16.mxu1 %v2684_v35  ;;  %v2369_v10 = vld [vmem:[#allocation2 + $0xd8] ss:$12 sps:$4 sm:$0xff]   ;;  %v2375_v11 = vld [vmem:[#allocation2 + $0xf4] ss:$12 sps:$4 sm:$0xff]   ;;  %v2378_v13 = vld [vmem:[#allocation2 + $0xf0] ss:$12 sps:$4 sm:$0xff]  }
  0x65   :  { %716 = vmatpush1.bf16.msra.mxu0 %v2294_v14  ;;  %v2380_v14 = vld [vmem:[#allocation2 + $0x10c] ss:$12 sps:$4 sm:$0xff]   ;;  %v2382_v15 = vld [vmem:[#allocation2 + $0x108] ss:$12 sps:$4 sm:$0xff]  }
  0x66   :  { %717 = vmatprep.subr.bf16.mxu0 %v2295_v18  ;;  %v2388_v18 = vld [vmem:[#allocation2 + $0x13c] ss:$12 sps:$4 sm:$0xff]  }
  0x67   :  { %2131 = vmatpush1.bf16.msra.mxu1 %v2688_v36 }
  0x68   :  { %2124 = vmatprep.subr.bf16.mxu1 %v2691_v38 }
  0x69   :  { %718 = vmatpush1.bf16.msra.mxu0 %v2297_v19  ;;  %v2390_v19 = vld [vmem:[#allocation2 + $0x138] ss:$12 sps:$4 sm:$0xff]  }
  0x6a   :  { %719 = vmatprep.subr.bf16.mxu0 %v2298_v22  ;;  %v2396_v22 = vld [vmem:[#allocation2 + $0x16c] ss:$12 sps:$4 sm:$0xff]  }
  0x6b   :  { %2132 = vmatpush1.bf16.msra.mxu1 %v2694_v41 }
  0x6c   :  { %2125 = vmatprep.subr.bf16.mxu1 %v2697_v42 }
  0x6d   :  { %720 = vmatpush1.bf16.msra.mxu0 %v2300_v23  ;;  %v2398_v23 = vld [vmem:[#allocation2 + $0x168] ss:$12 sps:$4 sm:$0xff]  }
  0x6e   :  { %721 = vmatprep.subr.bf16.mxu0 %v2301_v26  ;;  %v2402_v26 = vld [vmem:[#allocation2 + $0x38] ss:$12 sps:$4 sm:$0xff]  }
  0x6f   :  { %2133 = vmatpush1.bf16.msra.mxu1 %v2700_v44 }
  0x71   :  { %722 = vmatpush1.bf16.msra.mxu0 %v2303_v27  ;;  %v2403_v27 = vld [vmem:[#allocation2 + $0x50] ss:$12 sps:$4 sm:$0xff]  }
  0x72   :  { %723 = vmatprep.subr.bf16.mxu0 %v2304_v30  ;;  %1029 = vmatmul.mubr.bf16.vlgmr.msra.gmra.mrb[0].mxu1 %v2379_v47  ;;  %v2406_v30 = vld [vmem:[#allocation2 + $0x98] ss:$12 sps:$4 sm:$0xff]  }
  0x73   :  { %1038 = vmatprep.mubr.bf16.mxu1 %v2562_v12 }
  0x75   :  { %724 = vmatpush1.bf16.msra.mxu0 %v2306_v31  ;;  %v2410_v31 = vld [vmem:[#allocation7 + $0x40] sm:$0xff]  }
  0x76   :  { %725 = vmatprep.subr.bf16.mxu0 %v2307_v32  ;;  %1934 = vmatprep.subr.bf16.mxu1 %v2410_v31  ;;  %v2407_v32 = vld [vmem:[#allocation2 + $0xb0] ss:$12 sps:$4 sm:$0xff]  }
  0x79   :  { %726 = vmatpush1.bf16.msra.mxu0 %v2309_v37  ;;  %v2414_v37 = vld [vmem:[#allocation7 + $0x50] sm:$0xff]  }
  0x7a   :  { %727 = vmatprep.subr.bf16.mxu0 %v2310_v39  ;;  %1039 = vmatmul.mubr.bf16.gmra.mrb[4].mxu1 %v2383_v52  ;;  %v2409_v39 = vld [vmem:[#allocation2 + $0xe0] ss:$12 sps:$4 sm:$0xff]   ;;  %v2422_v52 = vld [vmem:[#allocation7 + $0x70] sm:$0xff]  }
  0x7b   :  { %1048 = vmatprep.mubr.bf16.mxu1 %v2562_v12 }
  0x7d   :  { %728 = vmatpush1.bf16.msra.mxu0 %v2312_v40  ;;  %v2416_v40 = vld [vmem:[#allocation7 + $0x58] sm:$0xff]  }
  0x7e   :  { %729 = vmatprep.subr.bf16.mxu0 %v2313_v43 }
  0x81   :  { %730 = vmatpush1.bf16.msra.mxu0 %v2315_v45 }
  0x82   :  { %731 = vmatprep.subr.bf16.mxu0 %v2316_v46  ;;  %1049 = vmatmul.mubr.bf16.gmra.mrb[8].mxu1 %v2387_v54  ;;  %v2419_v46 = vld [vmem:[#allocation7 + $0x20] sm:$0xff]   ;;  %v2423_v54 = vld [vmem:[#allocation7 + $0x30] sm:$0xff]  }
  0x83   :  { %1058 = vmatprep.mubr.bf16.mxu1 %v2562_v12 }
  0x85   :  { %732 = vmatpush1.bf16.msra.mxu0 %v2318_v48  ;;  %v2420_v48 = vld [vmem:[#allocation7 + $0x68] sm:$0xff]  }
  0x86   :  { %733 = vmatprep.subr.bf16.mxu0 %v2319_v49  ;;  %v2421_v49 = vld [vmem:[#allocation7 + $0x28] sm:$0xff]  }
  0x89   :  { %734 = vmatpush1.bf16.msra.mxu0 %v2321_v50 }
  0x8a   :  { %896 = vmatprep.subr.bf16.mxu0 %v2658_v17  ;;  %1059 = vmatmul.mubr.bf16.gmra.mrb[12].mxu1 %v2391_v57  ;;  %v2386_v17 = vld [vmem:[#allocation2 + $0x120] ss:$12 sps:$4 sm:$0xff]  }
  0x8b   :  { %1068 = vmatprep.mubr.bf16.mxu1 %v2562_v12 }
  0x8c   :  { %736 = vmatmul.mubr.bf16.vlgmr.msra.gmra.mrb[0].mxu0 %v2322_v51 }
  0x8d   :  { %897 = vmatpush1.bf16.msra.mxu0 %v2656_v16  ;;  %745 = vmatprep.mubr.bf16.mxu0 %v2328_v53  ;;  %v2384_v16 = vld [vmem:[#allocation2 + $0x124] ss:$12 sps:$4 sm:$0xff]  }
  0x8e   :  { %898 = vmatprep.subr.bf16.mxu0 %v2664_v21  ;;  %v2394_v21 = vld [vmem:[#allocation2 + $0x150] ss:$12 sps:$4 sm:$0xff]  }
  0x91   :  { %899 = vmatpush1.bf16.msra.mxu0 %v2662_v20  ;;  %v2392_v20 = vld [vmem:[#allocation2 + $0x154] ss:$12 sps:$4 sm:$0xff]  }
  0x92   :  { %900 = vmatprep.subr.bf16.mxu0 %v2670_v25  ;;  %1069 = vmatmul.mubr.bf16.gmra.mrb[16].mxu1 %v2395_v60  ;;  %v2401_v25 = vld [vmem:[#allocation2 + $0x20] ss:$12 sps:$4 sm:$0xff]  }
  0x93   :  { %1078 = vmatprep.mubr.bf16.mxu1 %v2562_v12 }
  0x94   :  { %746 = vmatmul.mubr.bf16.gmra.mrb[4].mxu0 %v2330_v55  ;;  %v2424_v55 = vld [vmem:[#allocation7 + $0x78] sm:$0xff]  }
  0x95   :  { %755 = vmatprep.mubr.bf16.mxu0 %v2331_v56  ;;  %901 = vmatpush1.bf16.msra.mxu0 %v2668_v24  ;;  %v2400_v24 = vld [vmem:[#allocation2 + $0x8] ss:$12 sps:$4 sm:$0xff]   ;;  %v2425_v56 = vld [vmem:[#allocation7 + $0x38] sm:$0xff]  }
  0x96   :  { %902 = vmatprep.subr.bf16.mxu0 %v2676_v29  ;;  %v2405_v29 = vld [vmem:[#allocation2 + $0x80] ss:$12 sps:$4 sm:$0xff]  }
  0x99   :  { %903 = vmatpush1.bf16.msra.mxu0 %v2674_v28  ;;  %v2404_v28 = vld [vmem:[#allocation2 + $0x68] ss:$12 sps:$4 sm:$0xff]  }
  0x9a   :  { %904 = vmatprep.subr.bf16.mxu0 %v2682_v34  ;;  %1079 = vmatmul.mubr.bf16.gmra.mrb[20].mxu1 %v2399_v63  ;;  %v2412_v34 = vld [vmem:[#allocation7 + $0x48] sm:$0xff]  }
  0x9c   :  { %756 = vmatmul.mubr.bf16.gmra.mrb[8].mxu0 %v2333_v58 }
  0x9d   :  { %765 = vmatprep.mubr.bf16.mxu0 %v2337_v59  ;;  %905 = vmatpush1.bf16.msra.mxu0 %v2680_v33  ;;  %v2411_v33 = vld [vmem:[#allocation7] sm:$0xff]  }
  0x9e   :  { %906 = vmatprep.subr.bf16.mxu0 %v2684_v35  ;;  %1935 = vmatpush3.bf16.msra.mxu1 %v2411_v33  ;;  %v2413_v35 = vld [vmem:[#allocation7 + $0x8] sm:$0xff]  }
  0x9f   :  { %1936 = vmatprep.subr.bf16.mxu1 %v2412_v34 }
  0xa1   :  { %907 = vmatpush1.bf16.msra.mxu0 %v2688_v36  ;;  %v2408_v36 = vld [vmem:[#allocation2 + $0xc8] ss:$12 sps:$4 sm:$0xff]  }
  0xa2   :  { %908 = vmatprep.subr.bf16.mxu0 %v2691_v38  ;;  %1937 = vmatpush3.bf16.msra.mxu1 %v2413_v35  ;;  %v2415_v38 = vld [vmem:[#allocation7 + $0x10] sm:$0xff]  }
  0xa3   :  { %1938 = vmatprep.subr.bf16.mxu1 %v2414_v37 }
  0xa4   :  { %766 = vmatmul.mubr.bf16.gmra.mrb[12].mxu0 %v2339_v61 }
  0xa5   :  { %775 = vmatprep.mubr.bf16.mxu0 %v2340_v62  ;;  %909 = vmatpush1.bf16.msra.mxu0 %v2694_v41  ;;  %v2417_v41 = vld [vmem:[#allocation7 + $0x18] sm:$0xff]  }
  0xa6   :  { %910 = vmatprep.subr.bf16.mxu0 %v2697_v42  ;;  %1939 = vmatpush3.bf16.msra.mxu1 %v2415_v38  ;;  %v2418_v42 = vld [vmem:[#allocation7 + $0x60] sm:$0xff]  }
  0xa7   :  { %1940 = vmatprep.subr.bf16.mxu1 %v2416_v40 }
  0xa9   :  { %911 = vmatpush1.bf16.msra.mxu0 %v2700_v44 }
  0xaa   :  { %1941 = vmatpush3.bf16.msra.mxu1 %v2417_v41 }
  0xab   :  { %1942 = vmatprep.subr.bf16.mxu1 %v2418_v42 }
  0xac   :  { %776 = vmatmul.mubr.bf16.gmra.mrb[16].mxu0 %v2342_v0 }
  0xad   :  { %785 = vmatprep.mubr.bf16.mxu0 %v2346_v1 }
  0xae   :  { %1943 = vmatpush3.bf16.msra.mxu1 %v2419_v46 }
  0xaf   :  { %1944 = vmatprep.subr.bf16.mxu1 %v2420_v48 }
  0xb2   :  { %1945 = vmatpush3.bf16.msra.mxu1 %v2421_v49 }
  0xb3   :  { %1946 = vmatprep.subr.bf16.mxu1 %v2422_v52 }
  0xb4   :  { %786 = vmatmul.mubr.bf16.gmra.mrb[20].mxu0 %v2348_v2 }
  0xb5   :  { %795 = vmatprep.mubr.bf16.mxu0 %v2349_v3 }
  0xb6   :  { %1947 = vmatpush3.bf16.msra.mxu1 %v2423_v54 }
  0xb7   :  { %1948 = vmatprep.subr.bf16.mxu1 %v2424_v55 }
  0xba   :  { %1949 = vmatpush3.bf16.msra.mxu1 %v2425_v56 }
  0xbc   :  { %796 = vmatmul.mubr.bf16.gmra.mrb[24].mxu0 %v2351_v4 }
  0xbd   :  { %805 = vmatprep.mubr.bf16.mxu0 %v2355_v5 }
  0xc4   :  { %806 = vmatmul.mubr.bf16.gmra.mrb[28].mxu0 %v2357_v6 }
  0xc5   :  { %815 = vmatprep.mubr.bf16.mxu0 %v2358_v7 }
  0xcc   :  { %816 = vmatmul.mubr.bf16.gmra.mrb[32].mxu0 %v2360_v8 }
  0xcd   :  { %825 = vmatprep.mubr.bf16.mxu0 %v2366_v9  ;;  %v197_v9 = vlaneseq }
  0xd4   :  { %826 = vmatmul.mubr.bf16.gmra.mrb[36].mxu0 %v2369_v10  ;;  %v198_v10 = vshrl.u32 %v197_v9, 7 }
  0xd5   :  { %835 = vmatprep.mubr.bf16.mxu0 %v2375_v11 }
  0xd6   :  { %v199_v11 = vsub.s32 0, %v198_v10 }
  0xdc   :  { %836 = vmatmul.mubr.bf16.gmra.mrb[40].mxu0 %v2378_v13  ;;  %v195_v13 = vld [vmem:[%s2981_s2] sm:$0x3] }
  0xdd   :  { %845 = vmatprep.mubr.bf16.mxu0 %v2380_v14  ;;  %v203_v14 = vsub.s32 1, %v198_v10 }
  0xe4   :  { %846 = vmatmul.mubr.bf16.gmra.mrb[44].mxu0 %v2382_v15  ;;  %v2770_v15 = vrot.slane %v195_v13, %v199_v11 }
  0xe5   :  { %855 = vmatprep.mubr.bf16.mxu0 %v2384_v16  ;;  %v2772_v16 = vrot.slane %v195_v13, %v203_v14 }
  0xec   :  { %856 = vmatmul.mubr.bf16.gmra.mrb[48].mxu0 %v2386_v17 }
  0xed   :  { %865 = vmatprep.mubr.bf16.mxu0 %v2388_v18 }
  0xf4   :  { %866 = vmatmul.mubr.bf16.gmra.mrb[52].mxu0 %v2390_v19 }
  0xf5   :  { %875 = vmatprep.mubr.bf16.mxu0 %v2392_v20 }
  0xfc   :  { %876 = vmatmul.mubr.bf16.gmra.mrb[56].mxu0 %v2394_v21 }
  0xfd   :  { %885 = vmatprep.mubr.bf16.mxu0 %v2396_v22 }
 0x104   :  { %886 = vmatmul.mubr.bf16.gmra.mrb[60].mxu0 %v2398_v23 }
 0x105   :  { %928 = vmatprep.mubr.bf16.mxu0 %v2562_v12 }
 0x10c   :  { %929 = vmatmul.mubr.bf16.vlgmr.msra.gmra.mrb[0].mxu0 %v2400_v24 }
 0x10d   :  { %938 = vmatprep.mubr.bf16.mxu0 %v2562_v12 }
 0x114   :  { %939 = vmatmul.mubr.bf16.gmra.mrb[4].mxu0 %v2401_v25 }
 0x115   :  { %948 = vmatprep.mubr.bf16.mxu0 %v2562_v12 }
 0x11c   :  { %949 = vmatmul.mubr.bf16.gmra.mrb[8].mxu0 %v2402_v26 }
 0x11d   :  { %958 = vmatprep.mubr.bf16.mxu0 %v2562_v12 }
 0x124   :  { %959 = vmatmul.mubr.bf16.gmra.mrb[12].mxu0 %v2403_v27 }
 0x125   :  { %968 = vmatprep.mubr.bf16.mxu0 %v2562_v12 }
 0x12c   :  { %969 = vmatmul.mubr.bf16.gmra.mrb[16].mxu0 %v2404_v28 }
 0x12d   :  { %978 = vmatprep.mubr.bf16.mxu0 %v2562_v12 }
 0x134   :  { %979 = vmatmul.mubr.bf16.gmra.mrb[20].mxu0 %v2405_v29 }
 0x135   :  { %988 = vmatprep.mubr.bf16.mxu0 %v2562_v12 }
 0x13c   :  { %989 = vmatmul.mubr.bf16.gmra.mrb[24].mxu0 %v2406_v30 }
 0x13d   :  { %998 = vmatprep.mubr.bf16.mxu0 %v2562_v12 }
 0x144   :  { %999 = vmatmul.mubr.bf16.gmra.mrb[28].mxu0 %v2407_v32 }
 0x145   :  { %1008 = vmatprep.mubr.bf16.mxu0 %v2562_v12  ;;  %v1030_v43 = vpop.f32.mrb[0].mxu1 }
 0x146   :  { %v1032_v44 = vpop.f32.mrb[1].mxu1 }
 0x147   :  { %v1034_v45 = vpop.f32.mrb[2].mxu1 }
 0x148   :  { %v1036_v47 = vpop.f32.mrb[3].mxu1 }
 0x14c   :  { %1009 = vmatmul.mubr.bf16.gmra.mrb[32].mxu0 %v2408_v36 }
 0x14d   :  { %1018 = vmatprep.mubr.bf16.mxu0 %v2562_v12  ;;  %v1040_v50 = vpop.f32.mrb[4].mxu1 }
 0x14e   :  { %v1042_v12 = vpop.f32.mrb[5].mxu1 }
 0x14f   :  { %v1044_v51 = vpop.f32.mrb[6].mxu1 }
 0x150   :  { %v1046_v53 = vpop.f32.mrb[7].mxu1 }
 0x154   :  { %1019 = vmatmul.mubr.bf16.gmra.mrb[36].mxu0 %v2409_v39 }
 0x155   :  { %v2735_v57 = vpop.f32.mrb[8].mxu1 }
 0x156   :  { %v2737_v58 = vpop.f32.mrb[9].mxu1 }
 0x157   :  { %v2739_v59 = vpop.f32.mrb[10].mxu1 }
 0x158   :  { %v2741_v60 = vpop.f32.mrb[11].mxu1 }
 0x15d   :  { %v2743_v61 = vpop.f32.mrb[12].mxu1 }
 0x15e   :  { %v2745_v62 = vpop.f32.mrb[13].mxu1 }
 0x15f   :  { %v2747_v63 = vpop.f32.mrb[14].mxu1 }
 0x160   :  { %v2749_v0 = vpop.f32.mrb[15].mxu1 }
 0x165   :  { %v2751_v1 = vpop.f32.mrb[16].mxu1 }
 0x166   :  { %v2753_v2 = vpop.f32.mrb[17].mxu1 }
 0x167   :  { %v2755_v3 = vpop.f32.mrb[18].mxu1 }
 0x168   :  { %v2757_v4 = vpop.f32.mrb[19].mxu1 }
 0x16d   :  { %v2759_v5 = vpop.f32.mrb[20].mxu1 }
 0x16e   :  { %v2761_v6 = vpop.f32.mrb[21].mxu1 }
 0x16f   :  { %v2763_v7 = vpop.f32.mrb[22].mxu1 }
 0x170   :  { %v2765_v8 = vpop.f32.mrb[23].mxu1 }
 0x1af   :  { %v837_v17 = vpop.f32.mrb[40].mxu0 }
 0x1b0   :  { %v838_v18 = vadd.f32 %v837_v17, %v2770_v15  ;;  %v839_v19 = vpop.f32.mrb[41].mxu0 }
 0x1b1   :  { %v840_v20 = vadd.f32 %v839_v19, %v2772_v16  ;;  %v841_v21 = vpop.f32.mrb[42].mxu0 }
 0x1b2   :  { %v842_v22 = vadd.f32 %v841_v21, %v2770_v15  ;;  %v1031_v23 = vadd.f32 %v1030_v43, %v838_v18  ;;  %v843_v24 = vpop.f32.mrb[43].mxu0 }
 0x1b3   :  { %v844_v25 = vadd.f32 %v843_v24, %v2772_v16  ;;  %v1033_v26 = vadd.f32 %v1032_v44, %v840_v20 }
 0x1b4   :  { %v1035_v27 = vadd.f32 %v1034_v45, %v842_v22  ;;  %v1129_v29 = vmax.f32 %v1031_v23, 0.0 }
 0x1b5   :  { %v1037_v28 = vadd.f32 %v1036_v47, %v844_v25  ;;  %v1130_v31 = vmax.f32 %v1033_v26, 0.0 }
 0x1b6   :  { %v1131_v30 = vmax.f32 %v1035_v27, 0.0 }
 0x1b7   :  { %v1132_v32 = vmax.f32 %v1037_v28, 0.0  ;;  %v847_v33 = vpop.f32.mrb[44].mxu0 }
 0x1b8   :  { %v2778_v34 = vpack.c.bf16 %v1131_v30, %v1129_v29  ;;  %v848_v35 = vadd.f32 %v847_v33, %v2770_v15  ;;  %v849_v36 = vpop.f32.mrb[45].mxu0 }
 0x1b9   :  { %v2781_v37 = vpack.c.bf16 %v1132_v32, %v1130_v31  ;;  %v850_v38 = vadd.f32 %v849_v36, %v2772_v16  ;;  %v851_v39 = vpop.f32.mrb[46].mxu0 }
 0x1ba   :  { %v852_v40 = vadd.f32 %v851_v39, %v2770_v15  ;;  %v1041_v41 = vadd.f32 %v1040_v50, %v848_v35  ;;  %v853_v42 = vpop.f32.mrb[47].mxu0 }
 0x1bb   :  { %v854_v43 = vadd.f32 %v853_v42, %v2772_v16  ;;  %v1043_v44 = vadd.f32 %v1042_v12, %v850_v38 }
 0x1bc   :  { %v1045_v45 = vadd.f32 %v1044_v51, %v852_v40  ;;  %v1133_v47 = vmax.f32 %v1041_v41, 0.0 }
 0x1bd   :  { %v1047_v46 = vadd.f32 %v1046_v53, %v854_v43  ;;  %v1134_v49 = vmax.f32 %v1043_v44, 0.0 }
 0x1be   :  { %v1135_v48 = vmax.f32 %v1045_v45, 0.0 }
 0x1bf   :  { %v1136_v52 = vmax.f32 %v1047_v46, 0.0  ;;  %v857_v54 = vpop.f32.mrb[48].mxu0 }
 0x1c0   :  { %v2786_v55 = vpack.c.bf16 %v1135_v48, %v1133_v47  ;;  %v858_v56 = vadd.f32 %v857_v54, %v2770_v15  ;;  %v859_v9 = vpop.f32.mrb[49].mxu0 }
 0x1c1   :  { %v2789_v10 = vpack.c.bf16 %v1136_v52, %v1134_v49  ;;  %v860_v50 = vadd.f32 %v859_v9, %v2772_v16  ;;  %v861_v11 = vpop.f32.mrb[50].mxu0 }
 0x1c2   :  { %v862_v13 = vadd.f32 %v861_v11, %v2770_v15  ;;  %v1051_v12 = vadd.f32 %v2735_v57, %v858_v56  ;;  %v863_v51 = vpop.f32.mrb[51].mxu0 }
 0x1c3   :  { %v864_v53 = vadd.f32 %v863_v51, %v2772_v16  ;;  %v1053_v14 = vadd.f32 %v2737_v58, %v860_v50 }
 0x1c4   :  { %v1055_v17 = vadd.f32 %v2739_v59, %v862_v13  ;;  %v1137_v19 = vmax.f32 %v1051_v12, 0.0 }
 0x1c5   :  { %v1057_v18 = vadd.f32 %v2741_v60, %v864_v53  ;;  %v1138_v21 = vmax.f32 %v1053_v14, 0.0 }
 0x1c6   :  { %v1139_v20 = vmax.f32 %v1055_v17, 0.0 }
 0x1c7   :  { %v1140_v22 = vmax.f32 %v1057_v18, 0.0  ;;  %v867_v23 = vpop.f32.mrb[52].mxu0 }
 0x1c8   :  { %v2798_v24 = vpack.c.bf16 %v1139_v20, %v1137_v19  ;;  %v868_v25 = vadd.f32 %v867_v23, %v2770_v15  ;;  %v869_v26 = vpop.f32.mrb[53].mxu0 }
 0x1c9   :  { %v2801_v57 = vpack.c.bf16 %v1140_v22, %v1138_v21  ;;  %v870_v27 = vadd.f32 %v869_v26, %v2772_v16  ;;  %v871_v28 = vpop.f32.mrb[54].mxu0 }
 0x1ca   :  { %v872_v58 = vadd.f32 %v871_v28, %v2770_v15  ;;  %v1061_v59 = vadd.f32 %v2743_v61, %v868_v25  ;;  %v873_v60 = vpop.f32.mrb[55].mxu0 }
 0x1cb   :  { %v874_v29 = vadd.f32 %v873_v60, %v2772_v16  ;;  %v1063_v30 = vadd.f32 %v2745_v62, %v870_v27 }
 0x1cc   :  { %v1065_v31 = vadd.f32 %v2747_v63, %v872_v58  ;;  %v1141_v33 = vmax.f32 %v1061_v59, 0.0  ;;  %v2426_v59 = vld [vmem:[#allocation8] sm:$0xff]  }
 0x1cd   :  { %v1067_v32 = vadd.f32 %v2749_v0, %v874_v29  ;;  %v1142_v36 = vmax.f32 %v1063_v30, 0.0  ;;  %2070 = vmatprep.subr.bf16.mxu1 %v2426_v59 }
 0x1ce   :  { %v1143_v35 = vmax.f32 %v1065_v31, 0.0 }
 0x1cf   :  { %v1144_v38 = vmax.f32 %v1067_v32, 0.0  ;;  %v877_v39 = vpop.f32.mrb[56].mxu0 }
 0x1d0   :  { %v2810_v40 = vpack.c.bf16 %v1143_v35, %v1141_v33  ;;  %v878_v41 = vadd.f32 %v877_v39, %v2770_v15  ;;  %v879_v42 = vpop.f32.mrb[57].mxu0  ;;  %v2427_v39 = vld [vmem:[#allocation8 + $0x8] sm:$0xff]  }
 0x1d1   :  { %v2813_v61 = vpack.c.bf16 %v1144_v38, %v1142_v36  ;;  %v880_v43 = vadd.f32 %v879_v42, %v2772_v16  ;;  %v881_v44 = vpop.f32.mrb[58].mxu0 }
 0x1d2   :  { %v882_v62 = vadd.f32 %v881_v44, %v2770_v15  ;;  %v1071_v63 = vadd.f32 %v2751_v1, %v878_v41  ;;  %v883_v0 = vpop.f32.mrb[59].mxu0 }
 0x1d3   :  { %v884_v45 = vadd.f32 %v883_v0, %v2772_v16  ;;  %v1073_v46 = vadd.f32 %v2753_v2, %v880_v43 }
 0x1d4   :  { %v1075_v47 = vadd.f32 %v2755_v3, %v882_v62  ;;  %v1145_v49 = vmax.f32 %v1071_v63, 0.0 }
 0x1d5   :  { %v1077_v48 = vadd.f32 %v2757_v4, %v884_v45  ;;  %v1146_v54 = vmax.f32 %v1073_v46, 0.0  ;;  %v2428_v45 = vld [vmem:[#allocation8 + $0x10] sm:$0xff]  }
 0x1d6   :  { %v1147_v52 = vmax.f32 %v1075_v47, 0.0 }
 0x1d7   :  { %v1148_v56 = vmax.f32 %v1077_v48, 0.0  ;;  %v887_v9 = vpop.f32.mrb[60].mxu0 }
 0x1d8   :  { %v2822_v50 = vpack.c.bf16 %v1147_v52, %v1145_v49  ;;  %v888_v11 = vadd.f32 %v887_v9, %v2770_v15  ;;  %v889_v13 = vpop.f32.mrb[61].mxu0  ;;  %v2429_v9 = vld [vmem:[#allocation8 + $0x18] sm:$0xff]  }
 0x1d9   :  { %v2825_v1 = vpack.c.bf16 %v1148_v56, %v1146_v54  ;;  %v890_v12 = vadd.f32 %v889_v13, %v2772_v16  ;;  %v891_v51 = vpop.f32.mrb[62].mxu0 }
 0x1da   :  { %v892_v2 = vadd.f32 %v891_v51, %v2770_v15  ;;  %v1081_v3 = vadd.f32 %v2759_v5, %v888_v11  ;;  %v893_v4 = vpop.f32.mrb[63].mxu0 }
 0x1db   :  { %v894_v53 = vadd.f32 %v893_v4, %v2772_v16  ;;  %v1083_v14 = vadd.f32 %v2761_v6, %v890_v12 }
 0x1dc   :  { %v1085_v17 = vadd.f32 %v2763_v7, %v892_v2  ;;  %v1149_v19 = vmax.f32 %v1081_v3, 0.0 }
 0x1dd   :  { %v1087_v18 = vadd.f32 %v2765_v8, %v894_v53  ;;  %v1150_v21 = vmax.f32 %v1083_v14, 0.0 }
 0x1de   :  { %v1151_v20 = vmax.f32 %v1085_v17, 0.0 }
 0x1df   :  { %v1152_v22 = vmax.f32 %v1087_v18, 0.0  ;;  %v930_v23 = vpop.f32.mrb[0].mxu0 }
 0x1e0   :  { %v2834_v25 = vpack.c.bf16 %v1151_v20, %v1149_v19  ;;  %v2134_v26 = vadd.f32 %v930_v23, %v2770_v15  ;;  %v932_v27 = vpop.f32.mrb[1].mxu0 }
 0x1e1   :  { %v2837_v5 = vpack.c.bf16 %v1152_v22, %v1150_v21  ;;  %v2135_v28 = vadd.f32 %v932_v27, %v2772_v16  ;;  %v934_v58 = vpop.f32.mrb[2].mxu0 }
 0x1e2   :  { %v2136_v6 = vadd.f32 %v934_v58, %v2770_v15  ;;  %v936_v7 = vpop.f32.mrb[3].mxu0  ;;  %v1089_v60 = vmax.f32 %v2134_v26, 0.0 }
 0x1e3   :  { %v2137_v8 = vadd.f32 %v936_v7, %v2772_v16  ;;  %v1090_v30 = vmax.f32 %v2135_v28, 0.0 }
 0x1e4   :  { %v1091_v29 = vmax.f32 %v2136_v6, 0.0 }
 0x1e5   :  { %v1092_v31 = vmax.f32 %v2137_v8, 0.0 }
 0x1e6   :  { %v1153_v32 = vpack.c.bf16 %v1091_v29, %v1089_v60 }
 0x1e7   :  { %v1154_v33 = vpack.c.bf16 %v1092_v31, %v1090_v30  ;;  %v940_v35 = vpop.f32.mrb[4].mxu0 }
 0x1e8   :  { %v2138_v36 = vadd.f32 %v940_v35, %v2770_v15  ;;  %v942_v38 = vpop.f32.mrb[5].mxu0 }
 0x1e9   :  { %v2139_v41 = vadd.f32 %v942_v38, %v2772_v16  ;;  %v944_v42 = vpop.f32.mrb[6].mxu0  ;;  %1352 = vmatprep.mubr.bf16.mxu1 %v1154_v33 }
 0x1ea   :  { %v2140_v43 = vadd.f32 %v944_v42, %v2770_v15  ;;  %v946_v44 = vpop.f32.mrb[7].mxu0  ;;  %1353 = vmatmul.mubr.bf16.vlgmr.msra.gmra.mrb[24].mxu1 %v1153_v32  ;;  %v1093_v63 = vmax.f32 %v2138_v36, 0.0 }
 0x1eb   :  { %v2141_v62 = vadd.f32 %v946_v44, %v2772_v16  ;;  %2071 = vmatpush3.bf16.msra.mxu1 %v2426_v59  ;;  %v1094_v46 = vmax.f32 %v2139_v41, 0.0 }
 0x1ec   :  { %v1095_v0 = vmax.f32 %v2140_v43, 0.0  ;;  %2072 = vmatprep.subr.bf16.mxu1 %v2427_v39 }
 0x1ed   :  { %v1096_v47 = vmax.f32 %v2141_v62, 0.0 }
 0x1ee   :  { %v1155_v48 = vpack.c.bf16 %v1095_v0, %v1093_v63 }
 0x1ef   :  { %v1156_v49 = vpack.c.bf16 %v1096_v47, %v1094_v46  ;;  %v950_v52 = vpop.f32.mrb[8].mxu0  ;;  %2073 = vmatpush3.bf16.msra.mxu1 %v2427_v39 }
 0x1f0   :  { %v2142_v54 = vadd.f32 %v950_v52, %v2770_v15  ;;  %v952_v56 = vpop.f32.mrb[9].mxu0  ;;  %2074 = vmatprep.subr.bf16.mxu1 %v2428_v45 }
 0x1f1   :  { %v2143_v11 = vadd.f32 %v952_v56, %v2772_v16  ;;  %v954_v13 = vpop.f32.mrb[10].mxu0  ;;  %1360 = vmatprep.mubr.bf16.mxu1 %v1156_v49 }
 0x1f2   :  { %v2144_v12 = vadd.f32 %v954_v13, %v2770_v15  ;;  %v956_v51 = vpop.f32.mrb[11].mxu0  ;;  %1361 = vmatmul.mubr.bf16.gmra.mrb[28].mxu1 %v1155_v48  ;;  %v1097_v3 = vmax.f32 %v2142_v54, 0.0 }
 0x1f3   :  { %v2145_v2 = vadd.f32 %v956_v51, %v2772_v16  ;;  %2075 = vmatpush3.bf16.msra.mxu1 %v2428_v45  ;;  %v1098_v53 = vmax.f32 %v2143_v11, 0.0 }
 0x1f4   :  { %v1099_v4 = vmax.f32 %v2144_v12, 0.0  ;;  %2076 = vmatprep.subr.bf16.mxu1 %v2429_v9 }
 0x1f5   :  { %v1100_v14 = vmax.f32 %v2145_v2, 0.0 }
 0x1f6   :  { %v1157_v17 = vpack.c.bf16 %v1099_v4, %v1097_v3 }
 0x1f7   :  { %v1158_v18 = vpack.c.bf16 %v1100_v14, %v1098_v53  ;;  %v960_v19 = vpop.f32.mrb[12].mxu0  ;;  %2077 = vmatpush3.bf16.msra.mxu1 %v2429_v9 }
 0x1f8   :  { %v2146_v20 = vadd.f32 %v960_v19, %v2770_v15  ;;  %v962_v21 = vpop.f32.mrb[13].mxu0 }
 0x1f9   :  { %v2147_v22 = vadd.f32 %v962_v21, %v2772_v16  ;;  %v964_v23 = vpop.f32.mrb[14].mxu0  ;;  %1368 = vmatprep.mubr.bf16.mxu1 %v1158_v18 }
 0x1fa   :  { %v2148_v26 = vadd.f32 %v964_v23, %v2770_v15  ;;  %v966_v27 = vpop.f32.mrb[15].mxu0  ;;  %1369 = vmatmul.mubr.bf16.gmra.mrb[32].mxu1 %v1157_v17  ;;  %v1101_v58 = vmax.f32 %v2146_v20, 0.0 }
 0x1fb   :  { %v2149_v28 = vadd.f32 %v966_v27, %v2772_v16  ;;  %v1102_v7 = vmax.f32 %v2147_v22, 0.0 }
 0x1fc   :  { %v1103_v6 = vmax.f32 %v2148_v26, 0.0 }
 0x1fd   :  { %v1104_v59 = vmax.f32 %v2149_v28, 0.0 }
 0x1fe   :  { %v1159_v8 = vpack.c.bf16 %v1103_v6, %v1101_v58 }
 0x1ff   :  { %v1160_v60 = vpack.c.bf16 %v1104_v59, %v1102_v7  ;;  %v970_v29 = vpop.f32.mrb[16].mxu0 }
 0x200   :  { %v2150_v30 = vadd.f32 %v970_v29, %v2770_v15  ;;  %v972_v31 = vpop.f32.mrb[17].mxu0 }
 0x201   :  { %v2151_v32 = vadd.f32 %v972_v31, %v2772_v16  ;;  %v974_v33 = vpop.f32.mrb[18].mxu0  ;;  %1376 = vmatprep.mubr.bf16.mxu1 %v1160_v60 }
 0x202   :  { %v2152_v35 = vadd.f32 %v974_v33, %v2770_v15  ;;  %v976_v36 = vpop.f32.mrb[19].mxu0  ;;  %1377 = vmatmul.mubr.bf16.gmra.mrb[36].mxu1 %v1159_v8  ;;  %v1105_v39 = vmax.f32 %v2150_v30, 0.0 }
 0x203   :  { %v2153_v38 = vadd.f32 %v976_v36, %v2772_v16  ;;  %v1106_v42 = vmax.f32 %v2151_v32, 0.0 }
 0x204   :  { %v1107_v41 = vmax.f32 %v2152_v35, 0.0 }
 0x205   :  { %v1108_v43 = vmax.f32 %v2153_v38, 0.0 }
 0x206   :  { %v1161_v44 = vpack.c.bf16 %v1107_v41, %v1105_v39 }
 0x207   :  { %v1162_v62 = vpack.c.bf16 %v1108_v43, %v1106_v42  ;;  %v980_v63 = vpop.f32.mrb[20].mxu0 }
 0x208   :  { %v2154_v0 = vadd.f32 %v980_v63, %v2770_v15  ;;  %v982_v45 = vpop.f32.mrb[21].mxu0 }
 0x209   :  { %v2155_v46 = vadd.f32 %v982_v45, %v2772_v16  ;;  %v984_v47 = vpop.f32.mrb[22].mxu0  ;;  %1384 = vmatprep.mubr.bf16.mxu1 %v1162_v62 }
 0x20a   :  { %v2156_v48 = vadd.f32 %v984_v47, %v2770_v15  ;;  %v986_v49 = vpop.f32.mrb[23].mxu0  ;;  %1385 = vmatmul.mubr.bf16.gmra.mrb[40].mxu1 %v1161_v44  ;;  %v1109_v54 = vmax.f32 %v2154_v0, 0.0 }
 0x20b   :  { %v2157_v52 = vadd.f32 %v986_v49, %v2772_v16  ;;  %v1110_v9 = vmax.f32 %v2155_v46, 0.0 }
 0x20c   :  { %v1111_v56 = vmax.f32 %v2156_v48, 0.0 }
 0x20d   :  { %v1112_v11 = vmax.f32 %v2157_v52, 0.0 }
 0x20e   :  { %v1163_v13 = vpack.c.bf16 %v1111_v56, %v1109_v54 }
 0x20f   :  { %v1164_v12 = vpack.c.bf16 %v1112_v11, %v1110_v9  ;;  %v990_v51 = vpop.f32.mrb[24].mxu0 }
 0x210   :  { %v2158_v2 = vadd.f32 %v990_v51, %v2770_v15  ;;  %v992_v3 = vpop.f32.mrb[25].mxu0 }
 0x211   :  { %v2159_v4 = vadd.f32 %v992_v3, %v2772_v16  ;;  %v994_v53 = vpop.f32.mrb[26].mxu0  ;;  %1392 = vmatprep.mubr.bf16.mxu1 %v1164_v12 }
 0x212   :  { %v2160_v14 = vadd.f32 %v994_v53, %v2770_v15  ;;  %v996_v17 = vpop.f32.mrb[27].mxu0  ;;  %1393 = vmatmul.mubr.bf16.gmra.mrb[44].mxu1 %v1163_v13  ;;  %v1113_v19 = vmax.f32 %v2158_v2, 0.0 }
 0x213   :  { %v2161_v18 = vadd.f32 %v996_v17, %v2772_v16  ;;  %v1114_v21 = vmax.f32 %v2159_v4, 0.0  ;;  %v2430_v17 = vld [vmem:[#allocation8 + $0x20] sm:$0xff]  }
 0x214   :  { %v1115_v20 = vmax.f32 %v2160_v14, 0.0  ;;  %2078 = vmatprep.subr.bf16.mxu1 %v2430_v17 }
 0x215   :  { %v1116_v22 = vmax.f32 %v2161_v18, 0.0  ;;  %2079 = vmatpush3.bf16.msra.mxu1 %v2430_v17 }
 0x216   :  { %v1165_v23 = vpack.c.bf16 %v1115_v20, %v1113_v19 }
 0x217   :  { %v1166_v26 = vpack.c.bf16 %v1116_v22, %v1114_v21  ;;  %v1000_v27 = vpop.f32.mrb[28].mxu0 }
 0x218   :  { %v2162_v28 = vadd.f32 %v1000_v27, %v2770_v15  ;;  %v1002_v58 = vpop.f32.mrb[29].mxu0 }
 0x219   :  { %v2163_v6 = vadd.f32 %v1002_v58, %v2772_v16  ;;  %v1004_v7 = vpop.f32.mrb[30].mxu0  ;;  %1400 = vmatprep.mubr.bf16.mxu1 %v1166_v26 }
 0x21a   :  { %v2164_v59 = vadd.f32 %v1004_v7, %v2770_v15  ;;  %v1006_v8 = vpop.f32.mrb[31].mxu0  ;;  %1401 = vmatmul.mubr.bf16.gmra.mrb[48].mxu1 %v1165_v23  ;;  %v1117_v29 = vmax.f32 %v2162_v28, 0.0 }
 0x21b   :  { %v2165_v60 = vadd.f32 %v1006_v8, %v2772_v16  ;;  %v1118_v31 = vmax.f32 %v2163_v6, 0.0 }
 0x21c   :  { %v1119_v30 = vmax.f32 %v2164_v59, 0.0 }
 0x21d   :  { %v1120_v32 = vmax.f32 %v2165_v60, 0.0 }
 0x21e   :  { %v1167_v33 = vpack.c.bf16 %v1119_v30, %v1117_v29 }
 0x21f   :  { %v1168_v35 = vpack.c.bf16 %v1120_v32, %v1118_v31  ;;  %v1010_v36 = vpop.f32.mrb[32].mxu0 }
 0x220   :  { %v2166_v38 = vadd.f32 %v1010_v36, %v2770_v15  ;;  %v1012_v39 = vpop.f32.mrb[33].mxu0 }
 0x221   :  { %v2167_v41 = vadd.f32 %v1012_v39, %v2772_v16  ;;  %v1014_v42 = vpop.f32.mrb[34].mxu0  ;;  %1408 = vmatprep.mubr.bf16.mxu1 %v1168_v35 }
 0x222   :  { %v2168_v43 = vadd.f32 %v1014_v42, %v2770_v15  ;;  %v1016_v44 = vpop.f32.mrb[35].mxu0  ;;  %1409 = vmatmul.mubr.bf16.gmra.mrb[52].mxu1 %v1167_v33  ;;  %v1121_v63 = vmax.f32 %v2166_v38, 0.0 }
 0x223   :  { %v2169_v62 = vadd.f32 %v1016_v44, %v2772_v16  ;;  %v1122_v45 = vmax.f32 %v2167_v41, 0.0 }
 0x224   :  { %v1123_v0 = vmax.f32 %v2168_v43, 0.0 }
 0x225   :  { %v1124_v46 = vmax.f32 %v2169_v62, 0.0 }
 0x226   :  { %v1169_v47 = vpack.c.bf16 %v1123_v0, %v1121_v63 }
 0x227   :  { %v1170_v48 = vpack.c.bf16 %v1124_v46, %v1122_v45  ;;  %v1020_v49 = vpop.f32.mrb[36].mxu0 }
 0x228   :  { %v2170_v52 = vadd.f32 %v1020_v49, %v2770_v15  ;;  %v1022_v54 = vpop.f32.mrb[37].mxu0 }
 0x229   :  { %v2171_v56 = vadd.f32 %v1022_v54, %v2772_v16  ;;  %v1024_v9 = vpop.f32.mrb[38].mxu0  ;;  %1416 = vmatprep.mubr.bf16.mxu1 %v1170_v48 }
 0x22a   :  { %v2172_v11 = vadd.f32 %v1024_v9, %v2770_v15  ;;  %v1026_v13 = vpop.f32.mrb[39].mxu0  ;;  %1417 = vmatmul.mubr.bf16.gmra.mrb[56].mxu1 %v1169_v47  ;;  %v1125_v51 = vmax.f32 %v2170_v52, 0.0  ;;  %v2431_v15 = vld [vmem:[#allocation8 + $0x28] sm:$0xff]  }
 0x22b   :  { %v2173_v12 = vadd.f32 %v1026_v13, %v2772_v16  ;;  %v1126_v3 = vmax.f32 %v2171_v56, 0.0  ;;  %2080 = vmatprep.subr.bf16.mxu1 %v2431_v15  ;;  %v2432_v16 = vld [vmem:[#allocation8 + $0x30] sm:$0xff]  }
 0x22c   :  { %v1127_v2 = vmax.f32 %v2172_v11, 0.0  ;;  %2081 = vmatpush3.bf16.msra.mxu1 %v2431_v15 }
 0x22d   :  { %v1128_v4 = vmax.f32 %v2173_v12, 0.0  ;;  %2082 = vmatprep.subr.bf16.mxu1 %v2432_v16 }
 0x22e   :  { %v1171_v53 = vpack.c.bf16 %v1127_v2, %v1125_v51 }
 0x22f   :  { %v1172_v14 = vpack.c.bf16 %v1128_v4, %v1126_v3 }
 0x230   :  { %2083 = vmatpush3.bf16.msra.mxu1 %v2432_v16 }
 0x231   :  { %1424 = vmatprep.mubr.bf16.mxu1 %v1172_v14 }
 0x232   :  { %1425 = vmatmul.mubr.bf16.gmra.mrb[60].mxu1 %v1171_v53 }
 0x233   :  { %1432 = vmatprep.mubr.bf16.mxu1 %v2781_v37 }
 0x23a   :  { %1433 = vmatmul.mubr.bf16.gmra.mrb[64].mxu1 %v2778_v34  ;;  %v2433_v34 = vld [vmem:[#allocation8 + $0x38] sm:$0xff]  }
 0x23b   :  { %1440 = vmatprep.mubr.bf16.mxu1 %v2789_v10  ;;  %2084 = vmatprep.subr.bf16.mxu1 %v2433_v34 }
 0x23c   :  { %2085 = vmatpush3.bf16.msra.mxu1 %v2433_v34 }
 0x242   :  { %1441 = vmatmul.mubr.bf16.gmra.mrb[68].mxu1 %v2786_v55  ;;  %v2893_v55 = vld [vmem:[%s2983_s4] ss:$0 sm:$0xff] }
 0x243   :  { %1448 = vmatprep.mubr.bf16.mxu1 %v2801_v57 }
 0x24a   :  { %1449 = vmatmul.mubr.bf16.gmra.mrb[72].mxu1 %v2798_v24 }
 0x24b   :  { %1456 = vmatprep.mubr.bf16.mxu1 %v2813_v61 }
 0x252   :  { %1457 = vmatmul.mubr.bf16.gmra.mrb[76].mxu1 %v2810_v40 }
 0x253   :  { %1464 = vmatprep.mubr.bf16.mxu1 %v2825_v1 }
 0x25a   :  { %1465 = vmatmul.mubr.bf16.gmra.mrb[80].mxu1 %v2822_v50 }
 0x25b   :  { %1472 = vmatprep.mubr.bf16.mxu1 %v2837_v5 }
 0x262   :  { %1473 = vmatmul.mubr.bf16.gmra.mrb[84].mxu1 %v2834_v25 }
 0x2bd   :  { %v1950_v37 = vpop.f32.mrb[24].mxu1 }
 0x2be   :  { %v1951_v10 = vpop.f32.mrb[25].mxu1 }
 0x2bf   :  { %v1952_v24 = vadd.f32 %v1951_v10, %v1950_v37  ;;  %v1953_v57 = vpop.f32.mrb[26].mxu1 }
 0x2c0   :  { %v1954_v61 = vpop.f32.mrb[27].mxu1 }
 0x2c1   :  { %v1355_v40 = vadd.f32 %v1952_v24, %v2893_v55  ;;  %v1955_v18 = vadd.f32 %v1954_v61, %v1953_v57 }
 0x2c3   :  { %v1358_v1 = vadd.f32 %v1955_v18, %v2893_v55  ;;  %v1481_v50 = vmax.f32 %v1355_v40, 0.0 }
 0x2c5   :  { %v1482_v19 = vmax.f32 %v1358_v1, 0.0  ;;  %v1956_v5 = vpop.f32.mrb[28].mxu1 }
 0x2c6   :  { %v1957_v20 = vpop.f32.mrb[29].mxu1 }
 0x2c7   :  { %v1958_v25 = vadd.f32 %v1957_v20, %v1956_v5  ;;  %v1959_v21 = vpop.f32.mrb[30].mxu1  ;;  %v1513_v22 = vpack.c.bf16 %v1482_v19, %v1481_v50 }
 0x2c8   :  { %v1960_v23 = vpop.f32.mrb[31].mxu1 }
 0x2c9   :  { %v1363_v26 = vadd.f32 %v1958_v25, %v2893_v55  ;;  %v1961_v27 = vadd.f32 %v1960_v23, %v1959_v21  ;;  %2086 = vmatprep.mubr.bf16.mxu1 %v1513_v22 }
 0x2cb   :  { %v1366_v28 = vadd.f32 %v1961_v27, %v2893_v55  ;;  %v1483_v58 = vmax.f32 %v1363_v26, 0.0 }
 0x2cd   :  { %v1484_v6 = vmax.f32 %v1366_v28, 0.0  ;;  %v1962_v7 = vpop.f32.mrb[32].mxu1 }
 0x2ce   :  { %v1963_v59 = vpop.f32.mrb[33].mxu1 }
 0x2cf   :  { %v1514_v8 = vpack.c.bf16 %v1484_v6, %v1483_v58  ;;  %v1964_v60 = vadd.f32 %v1963_v59, %v1962_v7  ;;  %v1965_v29 = vpop.f32.mrb[34].mxu1 }
 0x2d0   :  { %v1966_v30 = vpop.f32.mrb[35].mxu1 }
 0x2d1   :  { %v1371_v31 = vadd.f32 %v1964_v60, %v2893_v55  ;;  %v1967_v32 = vadd.f32 %v1966_v30, %v1965_v29  ;;  %2087 = vmatmul.mubr.bf16.vlgmr.msra.gmra.mrb[88].mxu1 %v1514_v8 }
 0x2d3   :  { %v1374_v33 = vadd.f32 %v1967_v32, %v2893_v55  ;;  %v1485_v35 = vmax.f32 %v1371_v31, 0.0 }
 0x2d5   :  { %v1486_v36 = vmax.f32 %v1374_v33, 0.0  ;;  %v1968_v38 = vpop.f32.mrb[36].mxu1 }
 0x2d6   :  { %v1969_v39 = vpop.f32.mrb[37].mxu1 }
 0x2d7   :  { %v1970_v41 = vadd.f32 %v1969_v39, %v1968_v38  ;;  %v1971_v42 = vpop.f32.mrb[38].mxu1  ;;  %v1515_v43 = vpack.c.bf16 %v1486_v36, %v1485_v35 }
 0x2d8   :  { %v1972_v44 = vpop.f32.mrb[39].mxu1 }
 0x2d9   :  { %v1379_v62 = vadd.f32 %v1970_v41, %v2893_v55  ;;  %v1973_v63 = vadd.f32 %v1972_v44, %v1971_v42  ;;  %2090 = vmatprep.mubr.bf16.mxu1 %v1515_v43 }
 0x2db   :  { %v1382_v0 = vadd.f32 %v1973_v63, %v2893_v55  ;;  %v1487_v45 = vmax.f32 %v1379_v62, 0.0 }
 0x2dd   :  { %v1488_v46 = vmax.f32 %v1382_v0, 0.0  ;;  %v1974_v47 = vpop.f32.mrb[40].mxu1 }
 0x2de   :  { %v1975_v48 = vpop.f32.mrb[41].mxu1 }
 0x2df   :  { %v1976_v49 = vadd.f32 %v1975_v48, %v1974_v47  ;;  %v1977_v52 = vpop.f32.mrb[42].mxu1  ;;  %v1516_v54 = vpack.c.bf16 %v1488_v46, %v1487_v45 }
 0x2e0   :  { %v1978_v56 = vpop.f32.mrb[43].mxu1 }
 0x2e1   :  { %v1387_v9 = vadd.f32 %v1976_v49, %v2893_v55  ;;  %v1979_v11 = vadd.f32 %v1978_v56, %v1977_v52  ;;  %2091 = vmatmul.mubr.bf16.gmra.mrb[92].mxu1 %v1516_v54 }
 0x2e3   :  { %v1390_v13 = vadd.f32 %v1979_v11, %v2893_v55  ;;  %v1489_v12 = vmax.f32 %v1387_v9, 0.0 }
 0x2e5   :  { %v1490_v51 = vmax.f32 %v1390_v13, 0.0  ;;  %v1980_v2 = vpop.f32.mrb[44].mxu1 }
 0x2e6   :  { %v1981_v3 = vpop.f32.mrb[45].mxu1 }
 0x2e7   :  { %v1982_v4 = vadd.f32 %v1981_v3, %v1980_v2  ;;  %v1983_v53 = vpop.f32.mrb[46].mxu1  ;;  %v1517_v14 = vpack.c.bf16 %v1490_v51, %v1489_v12 }
 0x2e8   :  { %v1984_v17 = vpop.f32.mrb[47].mxu1 }
 0x2e9   :  { %v1395_v15 = vadd.f32 %v1982_v4, %v2893_v55  ;;  %v1985_v16 = vadd.f32 %v1984_v17, %v1983_v53  ;;  %2094 = vmatprep.mubr.bf16.mxu1 %v1517_v14 }
 0x2eb   :  { %v1398_v34 = vadd.f32 %v1985_v16, %v2893_v55  ;;  %v1491_v37 = vmax.f32 %v1395_v15, 0.0 }
 0x2ed   :  { %v1492_v10 = vmax.f32 %v1398_v34, 0.0  ;;  %v1986_v24 = vpop.f32.mrb[48].mxu1 }
 0x2ee   :  { %v1987_v57 = vpop.f32.mrb[49].mxu1 }
 0x2ef   :  { %v1988_v61 = vadd.f32 %v1987_v57, %v1986_v24  ;;  %v1989_v40 = vpop.f32.mrb[50].mxu1  ;;  %v1518_v18 = vpack.c.bf16 %v1492_v10, %v1491_v37 }
 0x2f0   :  { %v1990_v1 = vpop.f32.mrb[51].mxu1 }
 0x2f1   :  { %v1403_v50 = vadd.f32 %v1988_v61, %v2893_v55  ;;  %v1991_v19 = vadd.f32 %v1990_v1, %v1989_v40  ;;  %2095 = vmatmul.mubr.bf16.gmra.mrb[96].mxu1 %v1518_v18 }
 0x2f3   :  { %v1406_v5 = vadd.f32 %v1991_v19, %v2893_v55  ;;  %v1493_v20 = vmax.f32 %v1403_v50, 0.0 }
 0x2f5   :  { %v1494_v25 = vmax.f32 %v1406_v5, 0.0  ;;  %v1992_v21 = vpop.f32.mrb[52].mxu1 }
 0x2f6   :  { %v1993_v22 = vpop.f32.mrb[53].mxu1 }
 0x2f7   :  { %v1994_v23 = vadd.f32 %v1993_v22, %v1992_v21  ;;  %v1995_v26 = vpop.f32.mrb[54].mxu1  ;;  %v1519_v27 = vpack.c.bf16 %v1494_v25, %v1493_v20 }
 0x2f8   :  { %v1996_v28 = vpop.f32.mrb[55].mxu1 }
 0x2f9   :  { %v1411_v58 = vadd.f32 %v1994_v23, %v2893_v55  ;;  %v1997_v6 = vadd.f32 %v1996_v28, %v1995_v26  ;;  %2098 = vmatprep.mubr.bf16.mxu1 %v1519_v27 }
 0x2fb   :  { %v1414_v7 = vadd.f32 %v1997_v6, %v2893_v55  ;;  %v1495_v59 = vmax.f32 %v1411_v58, 0.0 }
 0x2fd   :  { %v1496_v8 = vmax.f32 %v1414_v7, 0.0  ;;  %v1998_v60 = vpop.f32.mrb[56].mxu1 }
 0x2fe   :  { %v1999_v29 = vpop.f32.mrb[57].mxu1 }
 0x2ff   :  { %v2000_v30 = vadd.f32 %v1999_v29, %v1998_v60  ;;  %v2001_v31 = vpop.f32.mrb[58].mxu1  ;;  %v1520_v32 = vpack.c.bf16 %v1496_v8, %v1495_v59 }
 0x300   :  { %v2002_v33 = vpop.f32.mrb[59].mxu1 }
 0x301   :  { %v1419_v35 = vadd.f32 %v2000_v30, %v2893_v55  ;;  %v2003_v36 = vadd.f32 %v2002_v33, %v2001_v31  ;;  %2099 = vmatmul.mubr.bf16.gmra.mrb[100].mxu1 %v1520_v32 }
 0x303   :  { %v1422_v38 = vadd.f32 %v2003_v36, %v2893_v55  ;;  %v1497_v39 = vmax.f32 %v1419_v35, 0.0 }
 0x305   :  { %v1498_v41 = vmax.f32 %v1422_v38, 0.0  ;;  %v2004_v42 = vpop.f32.mrb[60].mxu1 }
 0x306   :  { %v2005_v43 = vpop.f32.mrb[61].mxu1 }
 0x307   :  { %v2006_v44 = vadd.f32 %v2005_v43, %v2004_v42  ;;  %v2007_v62 = vpop.f32.mrb[62].mxu1  ;;  %v1521_v63 = vpack.c.bf16 %v1498_v41, %v1497_v39 }
 0x308   :  { %v2008_v0 = vpop.f32.mrb[63].mxu1 }
 0x309   :  { %v1427_v45 = vadd.f32 %v2006_v44, %v2893_v55  ;;  %v2009_v46 = vadd.f32 %v2008_v0, %v2007_v62  ;;  %2102 = vmatprep.mubr.bf16.mxu1 %v1521_v63 }
 0x30b   :  { %v1430_v47 = vadd.f32 %v2009_v46, %v2893_v55  ;;  %v1499_v48 = vmax.f32 %v1427_v45, 0.0 }
 0x30d   :  { %v1500_v49 = vmax.f32 %v1430_v47, 0.0  ;;  %v2010_v52 = vpop.f32.mrb[64].mxu1 }
 0x30e   :  { %v2011_v54 = vpop.f32.mrb[65].mxu1 }
 0x30f   :  { %v2012_v56 = vadd.f32 %v2011_v54, %v2010_v52  ;;  %v2013_v9 = vpop.f32.mrb[66].mxu1  ;;  %v1522_v11 = vpack.c.bf16 %v1500_v49, %v1499_v48 }
 0x310   :  { %v2014_v13 = vpop.f32.mrb[67].mxu1 }
 0x311   :  { %v1435_v12 = vadd.f32 %v2012_v56, %v2893_v55  ;;  %v2015_v51 = vadd.f32 %v2014_v13, %v2013_v9  ;;  %2103 = vmatmul.mubr.bf16.gmra.mrb[104].mxu1 %v1522_v11  ;;  %v2930_v11 = vld [vmem:[%s2985_s6] ss:$0 sm:$0xff]  ;;  %s2563_s6 = smov [#allocation10]  }
 0x312   :  { %s1798_s10 = sshll.u32 %s2563_s6, 4  ;;  %s1799_s10 = int_to_ptr.vmem [resolvable:$true] %s1798_s10 }
 0x313   :  { %v1438_v2 = vadd.f32 %v2015_v51, %v2893_v55  ;;  %v1501_v3 = vmax.f32 %v1435_v12, 0.0  ;;  %s2522_s13 = scalar_lea.vmem %s1799_s10, 4096  ;;  %p2527_p5 = scmp.lt.s32.totalorder %s1799_s10, %s1799_s10 }
 0x314   :  { %p2523_p4 = scmp.ne.s32.totalorder %s1799_s10, %s2522_s13  ;;  %p2528_p6 = scmp.lt.s32.totalorder %s2522_s13, %s2522_s13 }
 0x315   :  { %v1502_v4 = vmax.f32 %v1438_v2, 0.0  ;;  %v2016_v53 = vpop.f32.mrb[68].mxu1 }
 0x316   :  { %v2017_v14 = vpop.f32.mrb[69].mxu1  ;;  %p2529_p7 = por %p2528_p6, %p2527_p5 }
 0x317   :  { %v2018_v17 = vadd.f32 %v2017_v14, %v2016_v53  ;;  %v2019_v15 = vpop.f32.mrb[70].mxu1  ;;  %v1523_v16 = vpack.c.bf16 %v1502_v4, %v1501_v3 }
 0x318   :  { %v2020_v34 = vpop.f32.mrb[71].mxu1  ;;  %p2530_p8 = pnand %p2529_p7, %p2523_p4 }
 0x319   :  { %v1443_v37 = vadd.f32 %v2018_v17, %v2893_v55  ;;  %v2021_v10 = vadd.f32 %v2020_v34, %v2019_v15  ;;  %2106 = vmatprep.mubr.bf16.mxu1 %v1523_v16 }
 0x31b   :  { %v1446_v24 = vadd.f32 %v2021_v10, %v2893_v55  ;;  %v1503_v57 = vmax.f32 %v1443_v37, 0.0 }
 0x31d   :  { %v1504_v61 = vmax.f32 %v1446_v24, 0.0  ;;  %v2022_v40 = vpop.f32.mrb[72].mxu1 }
 0x31e   :  { %v2023_v18 = vpop.f32.mrb[73].mxu1 }
 0x31f   :  { %v2024_v1 = vadd.f32 %v2023_v18, %v2022_v40  ;;  %v2025_v50 = vpop.f32.mrb[74].mxu1  ;;  %v1524_v19 = vpack.c.bf16 %v1504_v61, %v1503_v57 }
 0x320   :  { %v2026_v5 = vpop.f32.mrb[75].mxu1 }
 0x321   :  { %v1451_v20 = vadd.f32 %v2024_v1, %v2893_v55  ;;  %v2027_v25 = vadd.f32 %v2026_v5, %v2025_v50  ;;  %2107 = vmatmul.mubr.bf16.gmra.mrb[108].mxu1 %v1524_v19 }
 0x323   :  { %v1454_v21 = vadd.f32 %v2027_v25, %v2893_v55  ;;  %v1505_v22 = vmax.f32 %v1451_v20, 0.0 }
 0x325   :  { %v1506_v23 = vmax.f32 %v1454_v21, 0.0  ;;  %v2028_v26 = vpop.f32.mrb[76].mxu1 }
 0x326   :  { %v2029_v27 = vpop.f32.mrb[77].mxu1 }
 0x327   :  { %v2030_v28 = vadd.f32 %v2029_v27, %v2028_v26  ;;  %v2031_v58 = vpop.f32.mrb[78].mxu1  ;;  %v1525_v6 = vpack.c.bf16 %v1506_v23, %v1505_v22 }
 0x328   :  { %v2032_v7 = vpop.f32.mrb[79].mxu1 }
 0x329   :  { %v1459_v59 = vadd.f32 %v2030_v28, %v2893_v55  ;;  %v2033_v8 = vadd.f32 %v2032_v7, %v2031_v58  ;;  %2110 = vmatprep.mubr.bf16.mxu1 %v1525_v6 }
 0x32b   :  { %v1462_v60 = vadd.f32 %v2033_v8, %v2893_v55  ;;  %v1507_v29 = vmax.f32 %v1459_v59, 0.0 }
 0x32d   :  { %v1508_v30 = vmax.f32 %v1462_v60, 0.0  ;;  %v2034_v31 = vpop.f32.mrb[80].mxu1 }
 0x32e   :  { %v2035_v32 = vpop.f32.mrb[81].mxu1 }
 0x32f   :  { %v2036_v33 = vadd.f32 %v2035_v32, %v2034_v31  ;;  %v2037_v35 = vpop.f32.mrb[82].mxu1  ;;  %v1526_v36 = vpack.c.bf16 %v1508_v30, %v1507_v29 }
 0x330   :  { %v2038_v38 = vpop.f32.mrb[83].mxu1 }
 0x331   :  { %v1467_v39 = vadd.f32 %v2036_v33, %v2893_v55  ;;  %v2039_v41 = vadd.f32 %v2038_v38, %v2037_v35  ;;  %2111 = vmatmul.mubr.bf16.gmra.mrb[112].mxu1 %v1526_v36 }
 0x333   :  { %v1470_v42 = vadd.f32 %v2039_v41, %v2893_v55  ;;  %v1509_v43 = vmax.f32 %v1467_v39, 0.0 }
 0x335   :  { %v1510_v44 = vmax.f32 %v1470_v42, 0.0  ;;  %v2040_v62 = vpop.f32.mrb[84].mxu1 }
 0x336   :  { %v2041_v63 = vpop.f32.mrb[85].mxu1 }
 0x337   :  { %v2042_v0 = vadd.f32 %v2041_v63, %v2040_v62  ;;  %v2043_v45 = vpop.f32.mrb[86].mxu1  ;;  %v1527_v46 = vpack.c.bf16 %v1510_v44, %v1509_v43 }
 0x338   :  { %v2044_v47 = vpop.f32.mrb[87].mxu1 }
 0x339   :  { %v1475_v48 = vadd.f32 %v2042_v0, %v2893_v55  ;;  %v2045_v49 = vadd.f32 %v2044_v47, %v2043_v45  ;;  %2114 = vmatprep.mubr.bf16.mxu1 %v1527_v46 }
 0x33b   :  { %v1478_v52 = vadd.f32 %v2045_v49, %v2893_v55  ;;  %v1511_v54 = vmax.f32 %v1475_v48, 0.0 }
 0x33d   :  { %v1512_v56 = vmax.f32 %v1478_v52, 0.0 }
 0x33f   :  { %v1528_v9 = vpack.c.bf16 %v1512_v56, %v1511_v54 }
 0x341   :  { %2115 = vmatmul.mubr.bf16.gmra.mrb[116].mxu1 %v1528_v9 }
 0x3a4   :  { %v2088_v13 = vpop.f32.mrb[88].mxu1 }
 0x3a5   :  { %v1643_v12 = vadd.f32 %v2088_v13, %v2930_v11  ;;  %v1634_v51 = vpop.f32.mrb[89].mxu1 }
 0x3a6   :  { %v1635_v2 = vadd.f32 %v2930_v11, %v1634_v51  ;;  %v2089_v3 = vpop.f32.mrb[90].mxu1 }
 0x3a7   :  { %1763 = vst [vmem:[#allocation10 + $0x10] sm:$0xff] %v1643_v12  ;;  %v1646_v4 = vadd.f32 %v2089_v3, %v2930_v11  ;;  %v1637_v55 = vpop.f32.mrb[91].mxu1 }
 0x3a8   :  { %1761 = vst [vmem:[#allocation10] sm:$0xff] %v1635_v2  ;;  %v1638_v53 = vadd.f32 %v2930_v11, %v1637_v55 }
 0x3a9   :  { %1764 = vst [vmem:[#allocation10 + $0x18] sm:$0xff] %v1646_v4 }
 0x3aa   :  { %1762 = vst [vmem:[#allocation10 + $0x8] sm:$0xff] %v1638_v53 }
 0x3b4   :  { %v2092_v14 = vpop.f32.mrb[92].mxu1 }
 0x3b5   :  { %v1659_v17 = vadd.f32 %v2092_v14, %v2930_v11  ;;  %v1650_v15 = vpop.f32.mrb[93].mxu1 }
 0x3b6   :  { %v1651_v16 = vadd.f32 %v2930_v11, %v1650_v15  ;;  %v2093_v34 = vpop.f32.mrb[94].mxu1 }
 0x3b7   :  { %1767 = vst [vmem:[#allocation10 + $0x30] sm:$0xff] %v1659_v17  ;;  %v1662_v37 = vadd.f32 %v2093_v34, %v2930_v11  ;;  %v1653_v10 = vpop.f32.mrb[95].mxu1 }
 0x3b8   :  { %1765 = vst [vmem:[#allocation10 + $0x20] sm:$0xff] %v1651_v16  ;;  %v1654_v24 = vadd.f32 %v2930_v11, %v1653_v10 }
 0x3b9   :  { %1768 = vst [vmem:[#allocation10 + $0x38] sm:$0xff] %v1662_v37 }
 0x3ba   :  { %1766 = vst [vmem:[#allocation10 + $0x28] sm:$0xff] %v1654_v24 }
 0x3c4   :  { %v2096_v57 = vpop.f32.mrb[96].mxu1 }
 0x3c5   :  { %v1675_v61 = vadd.f32 %v2096_v57, %v2930_v11  ;;  %v1666_v40 = vpop.f32.mrb[97].mxu1 }
 0x3c6   :  { %v1667_v18 = vadd.f32 %v2930_v11, %v1666_v40  ;;  %v2097_v1 = vpop.f32.mrb[98].mxu1 }
 0x3c7   :  { %1771 = vst [vmem:[#allocation10 + $0x50] sm:$0xff] %v1675_v61  ;;  %v1678_v50 = vadd.f32 %v2097_v1, %v2930_v11  ;;  %v1669_v19 = vpop.f32.mrb[99].mxu1 }
 0x3c8   :  { %1769 = vst [vmem:[#allocation10 + $0x40] sm:$0xff] %v1667_v18  ;;  %v1670_v5 = vadd.f32 %v2930_v11, %v1669_v19 }
 0x3c9   :  { %1772 = vst [vmem:[#allocation10 + $0x58] sm:$0xff] %v1678_v50 }
 0x3ca   :  { %1770 = vst [vmem:[#allocation10 + $0x48] sm:$0xff] %v1670_v5 }
 0x3d4   :  { %v2100_v20 = vpop.f32.mrb[100].mxu1 }
 0x3d5   :  { %v1691_v25 = vadd.f32 %v2100_v20, %v2930_v11  ;;  %v1682_v21 = vpop.f32.mrb[101].mxu1 }
 0x3d6   :  { %v1683_v22 = vadd.f32 %v2930_v11, %v1682_v21  ;;  %v2101_v23 = vpop.f32.mrb[102].mxu1 }
 0x3d7   :  { %1775 = vst [vmem:[#allocation10 + $0x70] sm:$0xff] %v1691_v25  ;;  %v1694_v26 = vadd.f32 %v2101_v23, %v2930_v11  ;;  %v1685_v27 = vpop.f32.mrb[103].mxu1 }
 0x3d8   :  { %1773 = vst [vmem:[#allocation10 + $0x60] sm:$0xff] %v1683_v22  ;;  %v1686_v28 = vadd.f32 %v2930_v11, %v1685_v27 }
 0x3d9   :  { %1776 = vst [vmem:[#allocation10 + $0x78] sm:$0xff] %v1694_v26 }
 0x3da   :  { %1774 = vst [vmem:[#allocation10 + $0x68] sm:$0xff] %v1686_v28 }
 0x3e4   :  { %v2104_v58 = vpop.f32.mrb[104].mxu1 }
 0x3e5   :  { %v1707_v6 = vadd.f32 %v2104_v58, %v2930_v11  ;;  %v1698_v7 = vpop.f32.mrb[105].mxu1 }
 0x3e6   :  { %v1699_v59 = vadd.f32 %v2930_v11, %v1698_v7  ;;  %v2105_v8 = vpop.f32.mrb[106].mxu1 }
 0x3e7   :  { %1779 = vst [vmem:[#allocation10 + $0x90] sm:$0xff] %v1707_v6  ;;  %v1710_v60 = vadd.f32 %v2105_v8, %v2930_v11  ;;  %v1701_v29 = vpop.f32.mrb[107].mxu1 }
 0x3e8   :  { %1777 = vst [vmem:[#allocation10 + $0x80] sm:$0xff] %v1699_v59  ;;  %v1702_v30 = vadd.f32 %v2930_v11, %v1701_v29 }
 0x3e9   :  { %1780 = vst [vmem:[#allocation10 + $0x98] sm:$0xff] %v1710_v60 }
 0x3ea   :  { %1778 = vst [vmem:[#allocation10 + $0x88] sm:$0xff] %v1702_v30 }
 0x3f4   :  { %v2108_v31 = vpop.f32.mrb[108].mxu1 }
 0x3f5   :  { %v1723_v32 = vadd.f32 %v2108_v31, %v2930_v11  ;;  %v1714_v33 = vpop.f32.mrb[109].mxu1 }
 0x3f6   :  { %v1715_v35 = vadd.f32 %v2930_v11, %v1714_v33  ;;  %v2109_v36 = vpop.f32.mrb[110].mxu1 }
 0x3f7   :  { %1783 = vst [vmem:[#allocation10 + $0xb0] sm:$0xff] %v1723_v32  ;;  %v1726_v38 = vadd.f32 %v2109_v36, %v2930_v11  ;;  %v1717_v39 = vpop.f32.mrb[111].mxu1 }
 0x3f8   :  { %1781 = vst [vmem:[#allocation10 + $0xa0] sm:$0xff] %v1715_v35  ;;  %v1718_v41 = vadd.f32 %v2930_v11, %v1717_v39 }
 0x3f9   :  { %1784 = vst [vmem:[#allocation10 + $0xb8] sm:$0xff] %v1726_v38 }
 0x3fa   :  { %1782 = vst [vmem:[#allocation10 + $0xa8] sm:$0xff] %v1718_v41 }
 0x404   :  { %v2112_v42 = vpop.f32.mrb[112].mxu1 }
 0x405   :  { %v1739_v43 = vadd.f32 %v2112_v42, %v2930_v11  ;;  %v1730_v44 = vpop.f32.mrb[113].mxu1 }
 0x406   :  { %v1731_v62 = vadd.f32 %v2930_v11, %v1730_v44  ;;  %v2113_v63 = vpop.f32.mrb[114].mxu1 }
 0x407   :  { %1787 = vst [vmem:[#allocation10 + $0xd0] sm:$0xff] %v1739_v43  ;;  %v1742_v0 = vadd.f32 %v2113_v63, %v2930_v11  ;;  %v1733_v45 = vpop.f32.mrb[115].mxu1 }
 0x408   :  { %1785 = vst [vmem:[#allocation10 + $0xc0] sm:$0xff] %v1731_v62  ;;  %v1734_v46 = vadd.f32 %v2930_v11, %v1733_v45 }
 0x409   :  { %1788 = vst [vmem:[#allocation10 + $0xd8] sm:$0xff] %v1742_v0 }
 0x40a   :  { %1786 = vst [vmem:[#allocation10 + $0xc8] sm:$0xff] %v1734_v46 }
 0x414   :  { %v2116_v47 = vpop.f32.mrb[116].mxu1 }
 0x415   :  { %v1755_v48 = vadd.f32 %v2116_v47, %v2930_v11  ;;  %v1746_v49 = vpop.f32.mrb[117].mxu1 }
 0x416   :  { %v1747_v52 = vadd.f32 %v2930_v11, %v1746_v49  ;;  %v2117_v54 = vpop.f32.mrb[118].mxu1 }
 0x417   :  { %1791 = vst [vmem:[#allocation10 + $0xf0] sm:$0xff] %v1755_v48  ;;  %v1758_v56 = vadd.f32 %v2117_v54, %v2930_v11  ;;  %v1749_v9 = vpop.f32.mrb[119].mxu1 }
 0x418   :  { %1789 = vst [vmem:[#allocation10 + $0xe0] sm:$0xff] %v1747_v52  ;;  %v1750_v13 = vadd.f32 %v2930_v11, %v1749_v9 }
 0x419   :  { %1792 = vst [vmem:[#allocation10 + $0xf8] sm:$0xff] %v1758_v56 }
 0x41a   :  { %1790 = vst [vmem:[#allocation10 + $0xe8] sm:$0xff] %v1750_v13 }
 0x41b   :  { %2533 = shalt.err (!%p2530_p8)
}
 0x41c   :  { %s2534_s17 = scalar_lea.hbm %s2986_s7, 4096 }
 0x41d   :  { %p2535_p9 = scmp.ne.s32.totalorder %s2986_s7, %s2534_s17  ;;  %p2538_p10 = scmp.lt.u32.totalorder %s2534_s17, %s2986_s7 }
 0x41f   :  { %p2540_p11 = pnand %p2538_p10, %p2535_p9 }
 0x421   :  { %2543 = shalt.err (!%p2540_p11)
}
 0x422   :  { %1804 = dma.vmem_to_hbm [thread:$0]  %s1799_s10, 4096, %s2986_s7, [#allocation4], %s2553_s11, %s2553_s11, %s2554_s12  }
 0x423   :  { %2550 = dma.done.wait [#allocation4], 4096  }
 0x424   :  { %2551 = vsyncadd [#allocation4], 4294963200 }
 0x425   :  { %1808 = vsyncpa [#allocation3], 1 }
 0x426   :  { %1809 = vsyncpa [#allocation6], 1 }
 0x427   :  { %1810 = vsyncpa [#allocation9], 1 }
 0x428   :  { %1811 = vsyncpa [#allocation4], 1 }

</bundles_post_ra>
